<compile_context>
chip_gen: v6e
topology: v6e:2x2x1
jax: 0.10.0
libtpu: 0.0.40
codegen_flags: <defaults>
</compile_context>

<pallas_src>
import functools
import math

import jax
import jax.numpy as jnp
from jax import lax
from jax.experimental import pallas as pl
from jax.experimental.pallas import tpu as pltpu

EPS = 1e-5
CLAMP_VAL = 1e4


# ----------------------------------------------------------------------------
# Small helpers
# ----------------------------------------------------------------------------
def _layernorm(x, g, b):
    mu = jnp.mean(x, axis=-1, keepdims=True)
    var = jnp.mean((x - mu) ** 2, axis=-1, keepdims=True)
    return (x - mu) * lax.rsqrt(var + EPS) * g + b


def _quick_gelu(x, bf16_eup):
    # CLIP's QuickGELU: x * sigmoid(1.702 x).  On v6e/v7x the sigmoid runs in
    # bf16 (bf16 EUP, ~2x transcendental throughput); f32 elsewhere.
    if bf16_eup:
        s = jax.nn.sigmoid((1.702 * x).astype(jnp.bfloat16)).astype(jnp.float32)
    else:
        s = jax.nn.sigmoid(1.702 * x)
    return x * s


def _vmem_capacity_bytes():
    try:
        return int(pltpu.get_tpu_info().vmem_capacity_bytes)
    except Exception:
        return 64 << 20  # conservative (v7x-class) fallback


def _bf16_eup_available():
    try:
        kind = jax.devices()[0].device_kind.lower()
    except Exception:
        return False
    # No bf16 EUP/VPU on v2/v3/v4/v5e ("v5 lite"); available on v6e/v7x.
    return not any(t in kind for t in ("v2", "v3", "v4", "v5 lite", "v5lite", "v5e"))


def _estimate_vmem_bytes(b_tile, Lp, D, Dff, n_heads):
    """Rough per-step VMEM footprint for the fused layer kernel."""
    bl = b_tile * Lp
    weights = 2 * 2 * (D * 3 * D + D * D + 2 * D * Dff)          # bf16, double-buffered
    biases = 2 * 4 * (3 * D + 6 * D + Dff)
    io = 2 * 2 * bl * D + 2 * 4 * bl * D                         # bf16 x in + f32 residual out
    attn_slab = 4 * bl * D                                       # scratch
    act = 4 * (bl * 3 * D + bl * Dff + 3 * bl * D)               # qkv / h1 / misc f32
    act += 2 * 3 * bl * D                                        # q/k/v bf16
    act += 4 * 3 * b_tile * Lp * Lp                              # per-head score temps
    return weights + biases + io + attn_slab + act + (2 << 20)


def _pick_tiling(N, Lp, D, Dff, n_heads, vmem_cap):
    """Pick batch tile + scoped-VMEM request per generation."""
    if vmem_cap <= (64 << 20):        # v7x-class: 64 MiB physical per TensorCore
        target_rows, cap = 640, 44 << 20
    else:                              # v5e / v6e: 128 MiB physical
        target_rows, cap = 1280, 100 << 20
    bt = max(1, min(N, -(-target_rows // Lp)))
    while bt > 1 and _estimate_vmem_bytes(bt, Lp, D, Dff, n_heads) > cap:
        bt -= 1
    limit = max(32 << 20, int(1.3 * _estimate_vmem_bytes(bt, Lp, D, Dff, n_heads)))
    limit = min(limit, cap)
    return bt, limit


# ----------------------------------------------------------------------------
# Fused transformer kernel: grid = (batch_tile, layer).
# The output block (same index across the layer axis) holds the f32 residual
# stream resident in VMEM for the whole layer loop.
# ----------------------------------------------------------------------------
def fused_blocks_kernel(cp_ref, x_ref, ln1g_ref, ln1b_ref, wqkv_ref, bqkv_ref,
                        wo_ref, bo_ref, ln2g_ref, ln2b_ref, wfc_ref, bfc_ref,
                        wpr_ref, bpr_ref, o_ref, attn_ref, *, n_heads, n_deep,
                        bf16_eup):
    l = pl.program_id(1)

    # Layer 0: initialise the resident residual stream from the embedded prompts.
    @pl.when(l == 0)
    def _():
        o_ref[...] = x_ref[...].astype(o_ref.dtype)

    # MaPLe deep prompting: layers 1..n_deep replace tokens [1 : 1+n_ctx] with
    # the learnable compound prompt for that depth (torch counter logic).
    if n_deep > 0:
        n_ctx = cp_ref.shape[1]

        @pl.when((l >= 1) & (l <= n_deep))
        def _():
            ctx = cp_ref[0].astype(o_ref.dtype)                   # (n_ctx, D)
            b_tile = o_ref.shape[0]
            o_ref[:, 1:1 + n_ctx, :] = jnp.broadcast_to(
                ctx[None, :, :], (b_tile, n_ctx, ctx.shape[-1]))

    x3 = o_ref[...]                                               # (B, Lp, D) f32
    B, L, D = x3.shape
    BL = B * L
    H = n_heads
    dh = D // H
    xf = x3.reshape(BL, D)                                        # row-batched view (Lp % 8 == 0)

    # ---------------- attention sub-block ----------------
    y = _layernorm(xf, ln1g_ref[0], ln1b_ref[0])
    qkv = jnp.dot(y.astype(jnp.bfloat16), wqkv_ref[0],            # bf16 x bf16 -> f32
                  preferred_element_type=jnp.float32) + bqkv_ref[0]
    # 1/sqrt(dh) is pre-folded into the Q columns of wqkv/bqkv (see init_params).
    q3 = qkv[:, 0:D].reshape(B, L, D).astype(jnp.bfloat16)
    k3 = qkv[:, D:2 * D].reshape(B, L, D).astype(jnp.bfloat16)
    v3 = qkv[:, 2 * D:3 * D].reshape(B, L, D).astype(jnp.bfloat16)

    # Causal mask (query i attends to keys j <= i); padded key columns (>= real L)
    # are automatically masked for all real query rows.
    rows = lax.broadcasted_iota(jnp.int32, (L, L), 0)
    cols = lax.broadcasted_iota(jnp.int32, (L, L), 1)
    causal = (cols <= rows)[None, :, :]                           # (1, L, L)

    # Per-head attention, batched over the batch tile; each head's output is
    # written straight into the VMEM scratch slab (no list + lane concat).
    for h in range(H):                                            # static unroll
        sl = slice(h * dh, (h + 1) * dh)
        s = jnp.einsum('bqd,bkd->bqk', q3[:, :, sl], k3[:, :, sl],
                       preferred_element_type=jnp.float32)        # (B, L, L)
        s = jnp.where(causal, s, jnp.float32(-1e9))
        s = s - jnp.max(s, axis=-1, keepdims=True)
        p = jnp.exp(s)
        p = p * pl.reciprocal(jnp.sum(p, axis=-1, keepdims=True), approx=True)
        attn_ref[:, :, sl] = jnp.einsum('bqk,bkd->bqd', p.astype(jnp.bfloat16),
                                        v3[:, :, sl],
                                        preferred_element_type=jnp.float32)

    attn = attn_ref[...].reshape(BL, D)                           # (BL, D) f32
    attn = jnp.dot(attn.astype(jnp.bfloat16), wo_ref[0],
                   preferred_element_type=jnp.float32) + bo_ref[0]
    xf = xf + attn                                                # f32 residual

    # ---------------- MLP sub-block ----------------
    y2 = _layernorm(xf, ln2g_ref[0], ln2b_ref[0])
    h1 = jnp.dot(y2.astype(jnp.bfloat16), wfc_ref[0],
                 preferred_element_type=jnp.float32) + bfc_ref[0]
    h1 = _quick_gelu(h1, bf16_eup)
    h2 = jnp.dot(h1.astype(jnp.bfloat16), wpr_ref[0],
                 preferred_element_type=jnp.float32) + bpr_ref[0]
    xf = xf + h2

    o_ref[...] = xf.reshape(B, L, D).astype(o_ref.dtype)


def transformer_forward(x, deep_prompts, p, *, n_heads, b_tile=None):
    """x: (N, L, D) f32 residual stream (prompts + pos emb)."""
    N, L, D = x.shape
    n_layers = p["wqkv"].shape[0]
    Dff = p["wfc"].shape[-1]

    # Pad the sequence length to a sublane multiple so per-layer reshapes/stores
    # are layout-clean; padded rows/cols are masked (keys) or discarded (queries).
    Lp = -(-L // 8) * 8
    if Lp != L:
        x = jnp.pad(x, ((0, 0), (0, Lp - L), (0, 0)))

    # Stack the deep compound prompts -> (depth, n_ctx, D); dummy block if none.
    if deep_prompts:
        cp = jnp.stack([dp.astype(jnp.float32) for dp in deep_prompts], axis=0)
        n_deep = cp.shape[0]
    else:
        cp = jnp.zeros((1, 1, D), jnp.float32)
        n_deep = 0
    n_cp_blocks = cp.shape[0]
    n_ctx = cp.shape[1]

    # Batch tiling + VMEM budget per generation.
    vmem_cap = _vmem_capacity_bytes()
    if b_tile is None:
        b_tile, vmem_limit = _pick_tiling(N, Lp, D, Dff, n_heads, vmem_cap)
    else:
        b_tile = max(1, min(N, b_tile))
        cap = (44 << 20) if vmem_cap <= (64 << 20) else (100 << 20)
        vmem_limit = min(cap, max(32 << 20,
                                  int(1.3 * _estimate_vmem_bytes(b_tile, Lp, D, Dff, n_heads))))

    nb = pl.cdiv(N, b_tile)
    Np = nb * b_tile
    if Np != N:
        x = jnp.pad(x, ((0, Np - N), (0, 0), (0, 0)))
    # Layer-0 input only: bf16 halves its double-buffered VMEM footprint.
    x = x.astype(jnp.bfloat16)

    bf16_eup = _bf16_eup_available()

    def wmap(b, l):                      # per-layer stacked weights / biases
        return (l, 0, 0)

    def xmap(b, l):                      # residual stream: resident across the layer axis
        return (b, 0, 0)

    def cpmap(b, l):                     # compound prompt for this depth (clamped in range)
        return (jnp.minimum(jnp.maximum(l - 1, 0), n_cp_blocks - 1), 0, 0)

    kernel = functools.partial(fused_blocks_kernel, n_heads=n_heads,
                               n_deep=n_deep, bf16_eup=bf16_eup)

    out = pl.pallas_call(
        kernel,
        out_shape=jax.ShapeDtypeStruct((Np, Lp, D), jnp.float32),
        grid=(nb, n_layers),
        in_specs=[
            pl.BlockSpec((1, n_ctx, D), cpmap),        # compound prompts
            pl.BlockSpec((b_tile, Lp, D), xmap),       # input residual stream (bf16)
            pl.BlockSpec((1, 1, D), wmap),             # ln1 gamma
            pl.BlockSpec((1, 1, D), wmap),             # ln1 beta
            pl.BlockSpec((1, D, 3 * D), wmap),         # qkv weight (pre-transposed, bf16, Q pre-scaled)
            pl.BlockSpec((1, 1, 3 * D), wmap),         # qkv bias
            pl.BlockSpec((1, D, D), wmap),             # out-proj weight (bf16)
            pl.BlockSpec((1, 1, D), wmap),             # out-proj bias
            pl.BlockSpec((1, 1, D), wmap),             # ln2 gamma
            pl.BlockSpec((1, 1, D), wmap),             # ln2 beta
            pl.BlockSpec((1, D, Dff), wmap),           # mlp fc weight (bf16)
            pl.BlockSpec((1, 1, Dff), wmap),           # mlp fc bias
            pl.BlockSpec((1, Dff, D), wmap),           # mlp proj weight (bf16)
            pl.BlockSpec((1, 1, D), wmap),             # mlp proj bias
        ],
        out_specs=pl.BlockSpec((b_tile, Lp, D), xmap),
        scratch_shapes=[pltpu.VMEM((b_tile, Lp, D), jnp.float32)],   # per-head attention slab
        compiler_params=pltpu.CompilerParams(
            dimension_semantics=("parallel", "arbitrary"),
            vmem_limit_bytes=vmem_limit),
    )(cp, x, p["ln1g"], p["ln1b"], p["wqkv"], p["bqkv"], p["wo"], p["bo"],
      p["ln2g"], p["ln2b"], p["wfc"], p["bfc"], p["wpr"], p["bpr"])
    return out[:N, :L]


# ----------------------------------------------------------------------------
# Final head kernel: ln_final on the gathered EOT tokens + clamp + projection.
# The text_projection clamp is input-independent and hoisted to param setup.
# ----------------------------------------------------------------------------
def head_kernel(xe_ref, lng_ref, lnb_ref, proj_ref, o_ref):
    x = xe_ref[...].astype(jnp.float32)                        # (N, D)
    y = _layernorm(x, lng_ref[...], lnb_ref[...])
    y = jnp.clip(y, -CLAMP_VAL, CLAMP_VAL)
    o_ref[...] = jnp.dot(y.astype(jnp.bfloat16), proj_ref[...],
                         preferred_element_type=jnp.float32).astype(o_ref.dtype)


def head_forward(x_eot, ln_g, ln_b, text_proj_clamped):
    N, D = x_eot.shape
    Dout = text_proj_clamped.shape[1]
    return pl.pallas_call(
        head_kernel,
        out_shape=jax.ShapeDtypeStruct((N, Dout), jnp.float32),
        grid=(1,),
        in_specs=[
            pl.BlockSpec((N, D), lambda i: (0, 0)),
            pl.BlockSpec((1, D), lambda i: (0, 0)),
            pl.BlockSpec((1, D), lambda i: (0, 0)),
            pl.BlockSpec((D, Dout), lambda i: (0, 0)),
        ],
        out_specs=pl.BlockSpec((N, Dout), lambda i: (0, 0)),
    )(x_eot, ln_g, ln_b, text_proj_clamped)


# ----------------------------------------------------------------------------
# TextEncoder forward (MaPLe): prompts + pos_emb -> fused transformer (with
# deep compound-prompt injection) -> ln_final on EOT token -> clamp -> proj.
# ----------------------------------------------------------------------------
def text_encoder_forward(prompts, tokenized_prompts, compound_prompts_deeper_text, params):
    # TODO(synk): the torch NaN/Inf runtime assertions and the autocast fp16->fp32
    # branch are host-side guards with no Pallas equivalent; matmuls here run in
    # bf16 with f32 accumulation, statistics/residuals in f32.
    x = prompts.astype(jnp.float32) + params["pos_emb"][None, :, :].astype(jnp.float32)
    x = transformer_forward(x, compound_prompts_deeper_text, params,
                            n_heads=params["n_heads"])

    N = x.shape[0]
    eot_idx = jnp.argmax(tokenized_prompts, axis=-1)           # (N,)
    # ln_final is per-token, so gather-then-LN == LN-then-gather.
    x_eot = x[jnp.arange(N), eot_idx]                          # (N, D)
    return head_forward(x_eot, params["ln_f_g"], params["ln_f_b"],
                        params["text_proj_clamped"])


# ----------------------------------------------------------------------------
# Deterministic parameter init (synthetic, CLIP text-transformer shapes).
# Weights are stored pre-transposed (torch keeps (out, in)), layer-stacked and
# cast to bf16; LN params / biases stay f32.  One-time weight transforms:
#   * 1/sqrt(dh) attention scale folded into the Q third of wqkv/bqkv.
#   * text_projection clamp (input independent in the torch forward).
# ----------------------------------------------------------------------------
def init_params(key, n_layers, L, D, n_heads, Dout):
    Dff = 4 * D
    dh = D // n_heads
    scale = 1.0 / math.sqrt(dh)

    def w(k, shape):
        return 0.02 * jax.random.normal(k, shape, jnp.float32)

    wqkv, wo, wfc, wpr = [], [], [], []
    for li in range(n_layers):
        k = jax.random.fold_in(key, li)
        ks = jax.random.split(k, 4)
        wqkv.append(w(ks[0], (D, 3 * D)))
        wo.append(w(ks[1], (D, D)))
        wfc.append(w(ks[2], (D, Dff)))
        wpr.append(w(ks[3], (Dff, D)))

    wqkv = jnp.stack(wqkv)
    wqkv = wqkv.at[:, :, :D].multiply(scale)                    # fold 1/sqrt(dh) into Q weights
    bqkv = jnp.zeros((n_layers, 1, 3 * D), jnp.float32)
    bqkv = bqkv.at[:, :, :D].multiply(scale)                    # (kept for weight-import parity)

    kp, ke = jax.random.split(jax.random.fold_in(key, 10_000))
    text_proj = w(ke, (D, Dout))

    return dict(
        n_heads=n_heads,
        wqkv=wqkv.astype(jnp.bfloat16),
        bqkv=bqkv,
        wo=jnp.stack(wo).astype(jnp.bfloat16),
        bo=jnp.zeros((n_layers, 1, D), jnp.float32),
        wfc=jnp.stack(wfc).astype(jnp.bfloat16),
        bfc=jnp.zeros((n_layers, 1, Dff), jnp.float32),
        wpr=jnp.stack(wpr).astype(jnp.bfloat16),
        bpr=jnp.zeros((n_layers, 1, D), jnp.float32),
        ln1g=jnp.ones((n_layers, 1, D), jnp.float32),
        ln1b=jnp.zeros((n_layers, 1, D), jnp.float32),
        ln2g=jnp.ones((n_layers, 1, D), jnp.float32),
        ln2b=jnp.zeros((n_layers, 1, D), jnp.float32),
        pos_emb=0.01 * jax.random.normal(kp, (L, D), jnp.float32),
        ln_f_g=jnp.ones((1, D), jnp.float32),
        ln_f_b=jnp.zeros((1, D), jnp.float32),
        # torch clamps text_projection every forward; the clamp is input
        # independent, so it is hoisted to one-time parameter setup.
        # (If the projection is ever fine-tuned, re-apply the clamp per forward.)
        text_proj_clamped=jnp.clip(text_proj, -CLAMP_VAL, CLAMP_VAL).astype(jnp.bfloat16),
    )


if __name__ == "__main__":
    N, L, D = 2, 8, 32
    n_heads = 4
    n_layers = 3
    n_ctx = 2          # MaPLe compound-prompt context length
    depth = 2          # number of deep compound prompts (injected at layers 1, 2)
    Dout = 32

    key = jax.random.PRNGKey(0)
    k_params, k_prompts, k_deep = jax.random.split(key, 3)

    params = init_params(k_params, n_layers, L, D, n_heads, Dout)

    prompts = 0.1 * jax.random.normal(k_prompts, (N, L, D), jnp.float32)
    compound_prompts_deeper_text = [
        0.1 * jax.random.normal(jax.random.fold_in(k_deep, i), (n_ctx, D), jnp.float32)
        for i in range(depth)
    ]
    # tokenized prompts: argmax along seq gives the EOT position per row.
    tokenized_prompts = jnp.array(
        [[1, 5, 7, 49407, 0, 0, 0, 0],
         [1, 3, 49407, 0, 0, 0, 0, 0]], dtype=jnp.int32)

    out = text_encoder_forward(prompts, tokenized_prompts,
                               compound_prompts_deeper_text, params)
    out = jax.block_until_ready(out)
    assert out.shape == (N, Dout)
    assert bool(jnp.all(jnp.isfinite(out)))
    print("KERNEL_OK")
</pallas_src>

<mosaic_0001>
module attributes {stable_mosaic.version = 11 : i64} {
  func.func @fused_blocks_kernel(%arg0: i32, %arg1: i32, %arg2: memref<1x2x32xf32, #tpu.memory_space<vmem>>, %arg3: memref<2x8x32xbf16, #tpu.memory_space<vmem>>, %arg4: memref<1x1x32xf32, #tpu.memory_space<vmem>>, %arg5: memref<1x1x32xf32, #tpu.memory_space<vmem>>, %arg6: memref<1x32x96xbf16, #tpu.memory_space<vmem>>, %arg7: memref<1x1x96xf32, #tpu.memory_space<vmem>>, %arg8: memref<1x32x32xbf16, #tpu.memory_space<vmem>>, %arg9: memref<1x1x32xf32, #tpu.memory_space<vmem>>, %arg10: memref<1x1x32xf32, #tpu.memory_space<vmem>>, %arg11: memref<1x1x32xf32, #tpu.memory_space<vmem>>, %arg12: memref<1x32x128xbf16, #tpu.memory_space<vmem>>, %arg13: memref<1x1x128xf32, #tpu.memory_space<vmem>>, %arg14: memref<1x128x32xbf16, #tpu.memory_space<vmem>>, %arg15: memref<1x1x32xf32, #tpu.memory_space<vmem>>, %arg16: memref<2x8x32xf32, #tpu.memory_space<vmem>>, %arg17: memref<2x8x32xf32, #tpu.memory_space<vmem>>) attributes {dimension_semantics = [#tpu.dimension_semantics<parallel>, #tpu.dimension_semantics<arbitrary>], iteration_bounds = array<i64: 1, 3>, scalar_prefetch = 0 : i64, scratch_operands = 1 : i64, tpu.core_type = #tpu.core_type<tc>, window_params = [{transform_indices = @transform_0, window_bounds = array<i64: 1, 2, 32>}, {transform_indices = @transform_1, window_bounds = array<i64: 2, 8, 32>}, {transform_indices = @transform_2, window_bounds = array<i64: 1, 1, 32>}, {transform_indices = @transform_3, window_bounds = array<i64: 1, 1, 32>}, {transform_indices = @transform_4, window_bounds = array<i64: 1, 32, 96>}, {transform_indices = @transform_5, window_bounds = array<i64: 1, 1, 96>}, {transform_indices = @transform_6, window_bounds = array<i64: 1, 32, 32>}, {transform_indices = @transform_7, window_bounds = array<i64: 1, 1, 32>}, {transform_indices = @transform_8, window_bounds = array<i64: 1, 1, 32>}, {transform_indices = @transform_9, window_bounds = array<i64: 1, 1, 32>}, {transform_indices = @transform_10, window_bounds = array<i64: 1, 32, 128>}, {transform_indices = @transform_11, window_bounds = array<i64: 1, 1, 128>}, {transform_indices = @transform_12, window_bounds = array<i64: 1, 128, 32>}, {transform_indices = @transform_13, window_bounds = array<i64: 1, 1, 32>}, {transform_indices = @transform_14, window_bounds = array<i64: 2, 8, 32>}]} {
    %c0_i32 = arith.constant 0 : i32
    %0 = arith.cmpi eq, %arg1, %c0_i32 : i32
    %1 = arith.extui %0 : i1 to i32
    %c0_i32_0 = arith.constant 0 : i32
    %2 = arith.cmpi ne, %1, %c0_i32_0 : i32
    scf.if %2 {
      %c0_90 = arith.constant 0 : index
      %c0_91 = arith.constant 0 : index
      %c0_92 = arith.constant 0 : index
      %207 = vector.load %arg3[%c0_90, %c0_91, %c0_92] : memref<2x8x32xbf16, #tpu.memory_space<vmem>>, vector<2x8x32xbf16>
      %208 = arith.extf %207 : vector<2x8x32xbf16> to vector<2x8x32xf32>
      %c0_93 = arith.constant 0 : index
      %c0_94 = arith.constant 0 : index
      %c0_95 = arith.constant 0 : index
      %209 = vector.load %arg16[%c0_93, %c0_94, %c0_95] : memref<2x8x32xf32, #tpu.memory_space<vmem>>, vector<2x8x32xf32>
      tpu.vector_store %arg16[%c0_93, %c0_94, %c0_95], %208 {strides = array<i32>} : memref<2x8x32xf32, #tpu.memory_space<vmem>>, vector<2x8x32xf32>,
    } else {
    }
    %c1_i32 = arith.constant 1 : i32
    %3 = arith.cmpi sge, %arg1, %c1_i32 : i32
    %c2_i32 = arith.constant 2 : i32
    %4 = arith.cmpi sle, %arg1, %c2_i32 : i32
    %5 = arith.andi %3, %4 : i1
    %6 = arith.extui %5 : i1 to i32
    %c0_i32_1 = arith.constant 0 : i32
    %7 = arith.cmpi ne, %6, %c0_i32_1 : i32
    scf.if %7 {
      %c0_90 = arith.constant 0 : index
      %c0_91 = arith.constant 0 : index
      %c0_92 = arith.constant 0 : index
      %207 = vector.load %arg2[%c0_90, %c0_91, %c0_92] : memref<1x2x32xf32, #tpu.memory_space<vmem>>, vector<1x2x32xf32>
      %208 = vector.shape_cast %207 : vector<1x2x32xf32> to vector<2x32xf32>
      %209 = vector.shape_cast %208 : vector<2x32xf32> to vector<1x2x32xf32>
      %210 = vector.shape_cast %209 : vector<1x2x32xf32> to vector<1x2x32xf32>
      %211 = vector.broadcast %210 : vector<1x2x32xf32> to vector<2x2x32xf32>
      %c0_93 = arith.constant 0 : index
      %c1 = arith.constant 1 : index
      %c0_94 = arith.constant 0 : index
      %212 = vector.load %arg16[%c0_93, %c1, %c0_94] : memref<2x8x32xf32, #tpu.memory_space<vmem>>, vector<2x2x32xf32>
      tpu.vector_store %arg16[%c0_93, %c1, %c0_94], %211 {strides = array<i32>} : memref<2x8x32xf32, #tpu.memory_space<vmem>>, vector<2x2x32xf32>,
    } else {
    }
    %c0 = arith.constant 0 : index
    %c0_2 = arith.constant 0 : index
    %c0_3 = arith.constant 0 : index
    %8 = vector.load %arg16[%c0, %c0_2, %c0_3] : memref<2x8x32xf32, #tpu.memory_space<vmem>>, vector<2x8x32xf32>
    %9 = vector.shape_cast %8 : vector<2x8x32xf32> to vector<16x32xf32>
    %c0_4 = arith.constant 0 : index
    %c0_5 = arith.constant 0 : index
    %c0_6 = arith.constant 0 : index
    %10 = vector.load %arg4[%c0_4, %c0_5, %c0_6] : memref<1x1x32xf32, #tpu.memory_space<vmem>>, vector<1x1x32xf32>
    %11 = vector.shape_cast %10 : vector<1x1x32xf32> to vector<1x32xf32>
    %c0_7 = arith.constant 0 : index
    %c0_8 = arith.constant 0 : index
    %c0_9 = arith.constant 0 : index
    %12 = vector.load %arg5[%c0_7, %c0_8, %c0_9] : memref<1x1x32xf32, #tpu.memory_space<vmem>>, vector<1x1x32xf32>
    %13 = vector.shape_cast %12 : vector<1x1x32xf32> to vector<1x32xf32>
    %cst = arith.constant dense<0.000000e+00> : vector<16xf32>
    %14 = vector.multi_reduction <add>, %9, %cst [1] : vector<16x32xf32> to vector<16xf32>
    %15 = vector.shape_cast %14 : vector<16xf32> to vector<16x1xf32>
    %cst_10 = arith.constant 3.200000e+01 : f32
    %16 = vector.broadcast %cst_10 : f32 to vector<16x1xf32>
    %17 = arith.divf %15, %16 : vector<16x1xf32>
    %18 = vector.broadcast %17 : vector<16x1xf32> to vector<16x32xf32>
    %19 = arith.subf %9, %18 : vector<16x32xf32>
    %20 = arith.mulf %19, %19 : vector<16x32xf32>
    %cst_11 = arith.constant dense<0.000000e+00> : vector<16xf32>
    %21 = vector.multi_reduction <add>, %20, %cst_11 [1] : vector<16x32xf32> to vector<16xf32>
    %22 = vector.shape_cast %21 : vector<16xf32> to vector<16x1xf32>
    %cst_12 = arith.constant 3.200000e+01 : f32
    %23 = vector.broadcast %cst_12 : f32 to vector<16x1xf32>
    %24 = arith.divf %22, %23 : vector<16x1xf32>
    %25 = vector.broadcast %17 : vector<16x1xf32> to vector<16x32xf32>
    %26 = arith.subf %9, %25 : vector<16x32xf32>
    %cst_13 = arith.constant 9.99999974E-6 : f32
    %27 = vector.broadcast %cst_13 : f32 to vector<16x1xf32>
    %28 = arith.addf %24, %27 : vector<16x1xf32>
    %29 = math.rsqrt %28 : vector<16x1xf32>
    %30 = vector.broadcast %29 : vector<16x1xf32> to vector<16x32xf32>
    %31 = arith.mulf %26, %30 : vector<16x32xf32>
    %32 = vector.broadcast %11 : vector<1x32xf32> to vector<16x32xf32>
    %33 = arith.mulf %31, %32 : vector<16x32xf32>
    %34 = vector.broadcast %13 : vector<1x32xf32> to vector<16x32xf32>
    %35 = arith.addf %33, %34 : vector<16x32xf32>
    %36 = arith.truncf %35 : vector<16x32xf32> to vector<16x32xbf16>
    %c0_14 = arith.constant 0 : index
    %c0_15 = arith.constant 0 : index
    %c0_16 = arith.constant 0 : index
    %37 = vector.load %arg6[%c0_14, %c0_15, %c0_16] : memref<1x32x96xbf16, #tpu.memory_space<vmem>>, vector<1x32x96xbf16>
    %38 = vector.shape_cast %37 : vector<1x32x96xbf16> to vector<32x96xbf16>
    %cst_17 = arith.constant dense<0.000000e+00> : vector<16x96xf32>
    %39 = tpu.matmul %36, %38, %cst_17 {dimension_numbers = #tpu.dot_dimension_numbers<[1], [0], [0], [1], [0, 0, 1, 1], [], []>} : vector<16x32xbf16>, vector<32x96xbf16>, vector<16x96xf32> -> vector<16x96xf32>
    %c0_18 = arith.constant 0 : index
    %c0_19 = arith.constant 0 : index
    %c0_20 = arith.constant 0 : index
    %40 = vector.load %arg7[%c0_18, %c0_19, %c0_20] : memref<1x1x96xf32, #tpu.memory_space<vmem>>, vector<1x1x96xf32>
    %41 = vector.shape_cast %40 : vector<1x1x96xf32> to vector<1x96xf32>
    %42 = vector.broadcast %41 : vector<1x96xf32> to vector<16x96xf32>
    %43 = arith.addf %39, %42 : vector<16x96xf32>
    %44 = vector.extract_strided_slice %43 {offsets = [0, 0], sizes = [16, 32], strides = [1, 1]} : vector<16x96xf32> to vector<16x32xf32>
    %45 = vector.shape_cast %44 : vector<16x32xf32> to vector<2x8x32xf32>
    %46 = arith.truncf %45 : vector<2x8x32xf32> to vector<2x8x32xbf16>
    %47 = vector.extract_strided_slice %43 {offsets = [0, 32], sizes = [16, 32], strides = [1, 1]} : vector<16x96xf32> to vector<16x32xf32>
    %48 = vector.shape_cast %47 : vector<16x32xf32> to vector<2x8x32xf32>
    %49 = arith.truncf %48 : vector<2x8x32xf32> to vector<2x8x32xbf16>
    %50 = vector.extract_strided_slice %43 {offsets = [0, 64], sizes = [16, 32], strides = [1, 1]} : vector<16x96xf32> to vector<16x32xf32>
    %51 = vector.shape_cast %50 : vector<16x32xf32> to vector<2x8x32xf32>
    %52 = arith.truncf %51 : vector<2x8x32xf32> to vector<2x8x32xbf16>
    %53 = tpu.iota {dimensions = array<i32: 0>} : vector<8x8xi32>
    %54 = tpu.iota {dimensions = array<i32: 1>} : vector<8x8xi32>
    %55 = arith.cmpi sle, %54, %53 : vector<8x8xi32>
    %56 = vector.shape_cast %55 : vector<8x8xi1> to vector<1x8x8xi1>
    %57 = vector.extract_strided_slice %46 {offsets = [0, 0, 0], sizes = [2, 8, 8], strides = [1, 1, 1]} : vector<2x8x32xbf16> to vector<2x8x8xbf16>
    %58 = vector.extract_strided_slice %49 {offsets = [0, 0, 0], sizes = [2, 8, 8], strides = [1, 1, 1]} : vector<2x8x32xbf16> to vector<2x8x8xbf16>
    "tpu.trace_start"() <{level = 10 : i32, message = "bqd,bkd->bqk"}> : () -> ()
    %cst_21 = arith.constant dense<0.000000e+00> : vector<2x8x8xf32>
    %59 = tpu.matmul %57, %58, %cst_21 {dimension_numbers = #tpu.dot_dimension_numbers<[2], [2], [1], [1], [0, 0, 0, 1, 1, 1], [0], [0]>} : vector<2x8x8xbf16>, vector<2x8x8xbf16>, vector<2x8x8xf32> -> vector<2x8x8xf32>
    %cst_22 = arith.constant -1.000000e+09 : f32
    "tpu.trace_stop"() : () -> ()
    %60 = vector.shape_cast %56 : vector<1x8x8xi1> to vector<1x8x8xi1>
    %61 = vector.broadcast %60 : vector<1x8x8xi1> to vector<2x8x8xi1>
    %62 = vector.broadcast %cst_22 : f32 to vector<2x8x8xf32>
    %63 = arith.select %61, %59, %62 : vector<2x8x8xi1>, vector<2x8x8xf32>
    %cst_23 = arith.constant dense<0xFF800000> : vector<2x8xf32>
    %64 = vector.multi_reduction <maximumf>, %63, %cst_23 [2] : vector<2x8x8xf32> to vector<2x8xf32>
    %65 = vector.shape_cast %64 : vector<2x8xf32> to vector<2x8x1xf32>
    %66 = vector.broadcast %65 : vector<2x8x1xf32> to vector<2x8x8xf32>
    %67 = arith.subf %63, %66 : vector<2x8x8xf32>
    %68 = math.exp %67 : vector<2x8x8xf32>
    %cst_24 = arith.constant dense<0.000000e+00> : vector<2x8xf32>
    %69 = vector.multi_reduction <add>, %68, %cst_24 [2] : vector<2x8x8xf32> to vector<2x8xf32>
    %70 = vector.shape_cast %69 : vector<2x8xf32> to vector<2x8x1xf32>
    %71 = tpu.reciprocal %70 {approx = true} : vector<2x8x1xf32> -> vector<2x8x1xf32>
    %72 = vector.broadcast %71 : vector<2x8x1xf32> to vector<2x8x8xf32>
    %73 = arith.mulf %68, %72 : vector<2x8x8xf32>
    %74 = arith.truncf %73 : vector<2x8x8xf32> to vector<2x8x8xbf16>
    %75 = vector.extract_strided_slice %52 {offsets = [0, 0, 0], sizes = [2, 8, 8], strides = [1, 1, 1]} : vector<2x8x32xbf16> to vector<2x8x8xbf16>
    "tpu.trace_start"() <{level = 10 : i32, message = "bqk,bkd->bqd"}> : () -> ()
    %cst_25 = arith.constant dense<0.000000e+00> : vector<2x8x8xf32>
    %76 = tpu.matmul %74, %75, %cst_25 {dimension_numbers = #tpu.dot_dimension_numbers<[2], [1], [1], [2], [0, 0, 0, 1, 1, 2], [0], [0]>} : vector<2x8x8xbf16>, vector<2x8x8xbf16>, vector<2x8x8xf32> -> vector<2x8x8xf32>
    "tpu.trace_stop"() : () -> ()
    %c0_26 = arith.constant 0 : index
    %c0_27 = arith.constant 0 : index
    %c0_28 = arith.constant 0 : index
    %77 = vector.load %arg17[%c0_26, %c0_27, %c0_28] : memref<2x8x32xf32, #tpu.memory_space<vmem>>, vector<2x8x8xf32>
    tpu.vector_store %arg17[%c0_26, %c0_27, %c0_28], %76 {strides = array<i32>} : memref<2x8x32xf32, #tpu.memory_space<vmem>>, vector<2x8x8xf32>,
    %78 = vector.extract_strided_slice %46 {offsets = [0, 0, 8], sizes = [2, 8, 8], strides = [1, 1, 1]} : vector<2x8x32xbf16> to vector<2x8x8xbf16>
    %79 = vector.extract_strided_slice %49 {offsets = [0, 0, 8], sizes = [2, 8, 8], strides = [1, 1, 1]} : vector<2x8x32xbf16> to vector<2x8x8xbf16>
    "tpu.trace_start"() <{level = 10 : i32, message = "bqd,bkd->bqk"}> : () -> ()
    %cst_29 = arith.constant dense<0.000000e+00> : vector<2x8x8xf32>
    %80 = tpu.matmul %78, %79, %cst_29 {dimension_numbers = #tpu.dot_dimension_numbers<[2], [2], [1], [1], [0, 0, 0, 1, 1, 1], [0], [0]>} : vector<2x8x8xbf16>, vector<2x8x8xbf16>, vector<2x8x8xf32> -> vector<2x8x8xf32>
    %cst_30 = arith.constant -1.000000e+09 : f32
    "tpu.trace_stop"() : () -> ()
    %81 = vector.shape_cast %56 : vector<1x8x8xi1> to vector<1x8x8xi1>
    %82 = vector.broadcast %81 : vector<1x8x8xi1> to vector<2x8x8xi1>
    %83 = vector.broadcast %cst_30 : f32 to vector<2x8x8xf32>
    %84 = arith.select %82, %80, %83 : vector<2x8x8xi1>, vector<2x8x8xf32>
    %cst_31 = arith.constant dense<0xFF800000> : vector<2x8xf32>
    %85 = vector.multi_reduction <maximumf>, %84, %cst_31 [2] : vector<2x8x8xf32> to vector<2x8xf32>
    %86 = vector.shape_cast %85 : vector<2x8xf32> to vector<2x8x1xf32>
    %87 = vector.broadcast %86 : vector<2x8x1xf32> to vector<2x8x8xf32>
    %88 = arith.subf %84, %87 : vector<2x8x8xf32>
    %89 = math.exp %88 : vector<2x8x8xf32>
    %cst_32 = arith.constant dense<0.000000e+00> : vector<2x8xf32>
    %90 = vector.multi_reduction <add>, %89, %cst_32 [2] : vector<2x8x8xf32> to vector<2x8xf32>
    %91 = vector.shape_cast %90 : vector<2x8xf32> to vector<2x8x1xf32>
    %92 = tpu.reciprocal %91 {approx = true} : vector<2x8x1xf32> -> vector<2x8x1xf32>
    %93 = vector.broadcast %92 : vector<2x8x1xf32> to vector<2x8x8xf32>
    %94 = arith.mulf %89, %93 : vector<2x8x8xf32>
    %95 = arith.truncf %94 : vector<2x8x8xf32> to vector<2x8x8xbf16>
    %96 = vector.extract_strided_slice %52 {offsets = [0, 0, 8], sizes = [2, 8, 8], strides = [1, 1, 1]} : vector<2x8x32xbf16> to vector<2x8x8xbf16>
    "tpu.trace_start"() <{level = 10 : i32, message = "bqk,bkd->bqd"}> : () -> ()
    %cst_33 = arith.constant dense<0.000000e+00> : vector<2x8x8xf32>
    %97 = tpu.matmul %95, %96, %cst_33 {dimension_numbers = #tpu.dot_dimension_numbers<[2], [1], [1], [2], [0, 0, 0, 1, 1, 2], [0], [0]>} : vector<2x8x8xbf16>, vector<2x8x8xbf16>, vector<2x8x8xf32> -> vector<2x8x8xf32>
    "tpu.trace_stop"() : () -> ()
    %c0_34 = arith.constant 0 : index
    %c0_35 = arith.constant 0 : index
    %c8 = arith.constant 8 : index
    %98 = vector.load %arg17[%c0_34, %c0_35, %c8] : memref<2x8x32xf32, #tpu.memory_space<vmem>>, vector<2x8x8xf32>
    tpu.vector_store %arg17[%c0_34, %c0_35, %c8], %97 {strides = array<i32>} : memref<2x8x32xf32, #tpu.memory_space<vmem>>, vector<2x8x8xf32>,
    %99 = vector.extract_strided_slice %46 {offsets = [0, 0, 16], sizes = [2, 8, 8], strides = [1, 1, 1]} : vector<2x8x32xbf16> to vector<2x8x8xbf16>
    %100 = vector.extract_strided_slice %49 {offsets = [0, 0, 16], sizes = [2, 8, 8], strides = [1, 1, 1]} : vector<2x8x32xbf16> to vector<2x8x8xbf16>
    "tpu.trace_start"() <{level = 10 : i32, message = "bqd,bkd->bqk"}> : () -> ()
    %cst_36 = arith.constant dense<0.000000e+00> : vector<2x8x8xf32>
    %101 = tpu.matmul %99, %100, %cst_36 {dimension_numbers = #tpu.dot_dimension_numbers<[2], [2], [1], [1], [0, 0, 0, 1, 1, 1], [0], [0]>} : vector<2x8x8xbf16>, vector<2x8x8xbf16>, vector<2x8x8xf32> -> vector<2x8x8xf32>
    %cst_37 = arith.constant -1.000000e+09 : f32
    "tpu.trace_stop"() : () -> ()
    %102 = vector.shape_cast %56 : vector<1x8x8xi1> to vector<1x8x8xi1>
    %103 = vector.broadcast %102 : vector<1x8x8xi1> to vector<2x8x8xi1>
    %104 = vector.broadcast %cst_37 : f32 to vector<2x8x8xf32>
    %105 = arith.select %103, %101, %104 : vector<2x8x8xi1>, vector<2x8x8xf32>
    %cst_38 = arith.constant dense<0xFF800000> : vector<2x8xf32>
    %106 = vector.multi_reduction <maximumf>, %105, %cst_38 [2] : vector<2x8x8xf32> to vector<2x8xf32>
    %107 = vector.shape_cast %106 : vector<2x8xf32> to vector<2x8x1xf32>
    %108 = vector.broadcast %107 : vector<2x8x1xf32> to vector<2x8x8xf32>
    %109 = arith.subf %105, %108 : vector<2x8x8xf32>
    %110 = math.exp %109 : vector<2x8x8xf32>
    %cst_39 = arith.constant dense<0.000000e+00> : vector<2x8xf32>
    %111 = vector.multi_reduction <add>, %110, %cst_39 [2] : vector<2x8x8xf32> to vector<2x8xf32>
    %112 = vector.shape_cast %111 : vector<2x8xf32> to vector<2x8x1xf32>
    %113 = tpu.reciprocal %112 {approx = true} : vector<2x8x1xf32> -> vector<2x8x1xf32>
    %114 = vector.broadcast %113 : vector<2x8x1xf32> to vector<2x8x8xf32>
    %115 = arith.mulf %110, %114 : vector<2x8x8xf32>
    %116 = arith.truncf %115 : vector<2x8x8xf32> to vector<2x8x8xbf16>
    %117 = vector.extract_strided_slice %52 {offsets = [0, 0, 16], sizes = [2, 8, 8], strides = [1, 1, 1]} : vector<2x8x32xbf16> to vector<2x8x8xbf16>
    "tpu.trace_start"() <{level = 10 : i32, message = "bqk,bkd->bqd"}> : () -> ()
    %cst_40 = arith.constant dense<0.000000e+00> : vector<2x8x8xf32>
    %118 = tpu.matmul %116, %117, %cst_40 {dimension_numbers = #tpu.dot_dimension_numbers<[2], [1], [1], [2], [0, 0, 0, 1, 1, 2], [0], [0]>} : vector<2x8x8xbf16>, vector<2x8x8xbf16>, vector<2x8x8xf32> -> vector<2x8x8xf32>
    "tpu.trace_stop"() : () -> ()
    %c0_41 = arith.constant 0 : index
    %c0_42 = arith.constant 0 : index
    %c16 = arith.constant 16 : index
    %119 = vector.load %arg17[%c0_41, %c0_42, %c16] : memref<2x8x32xf32, #tpu.memory_space<vmem>>, vector<2x8x8xf32>
    tpu.vector_store %arg17[%c0_41, %c0_42, %c16], %118 {strides = array<i32>} : memref<2x8x32xf32, #tpu.memory_space<vmem>>, vector<2x8x8xf32>,
    %120 = vector.extract_strided_slice %46 {offsets = [0, 0, 24], sizes = [2, 8, 8], strides = [1, 1, 1]} : vector<2x8x32xbf16> to vector<2x8x8xbf16>
    %121 = vector.extract_strided_slice %49 {offsets = [0, 0, 24], sizes = [2, 8, 8], strides = [1, 1, 1]} : vector<2x8x32xbf16> to vector<2x8x8xbf16>
    "tpu.trace_start"() <{level = 10 : i32, message = "bqd,bkd->bqk"}> : () -> ()
    %cst_43 = arith.constant dense<0.000000e+00> : vector<2x8x8xf32>
    %122 = tpu.matmul %120, %121, %cst_43 {dimension_numbers = #tpu.dot_dimension_numbers<[2], [2], [1], [1], [0, 0, 0, 1, 1, 1], [0], [0]>} : vector<2x8x8xbf16>, vector<2x8x8xbf16>, vector<2x8x8xf32> -> vector<2x8x8xf32>
    %cst_44 = arith.constant -1.000000e+09 : f32
    "tpu.trace_stop"() : () -> ()
    %123 = vector.shape_cast %56 : vector<1x8x8xi1> to vector<1x8x8xi1>
    %124 = vector.broadcast %123 : vector<1x8x8xi1> to vector<2x8x8xi1>
    %125 = vector.broadcast %cst_44 : f32 to vector<2x8x8xf32>
    %126 = arith.select %124, %122, %125 : vector<2x8x8xi1>, vector<2x8x8xf32>
    %cst_45 = arith.constant dense<0xFF800000> : vector<2x8xf32>
    %127 = vector.multi_reduction <maximumf>, %126, %cst_45 [2] : vector<2x8x8xf32> to vector<2x8xf32>
    %128 = vector.shape_cast %127 : vector<2x8xf32> to vector<2x8x1xf32>
    %129 = vector.broadcast %128 : vector<2x8x1xf32> to vector<2x8x8xf32>
    %130 = arith.subf %126, %129 : vector<2x8x8xf32>
    %131 = math.exp %130 : vector<2x8x8xf32>
    %cst_46 = arith.constant dense<0.000000e+00> : vector<2x8xf32>
    %132 = vector.multi_reduction <add>, %131, %cst_46 [2] : vector<2x8x8xf32> to vector<2x8xf32>
    %133 = vector.shape_cast %132 : vector<2x8xf32> to vector<2x8x1xf32>
    %134 = tpu.reciprocal %133 {approx = true} : vector<2x8x1xf32> -> vector<2x8x1xf32>
    %135 = vector.broadcast %134 : vector<2x8x1xf32> to vector<2x8x8xf32>
    %136 = arith.mulf %131, %135 : vector<2x8x8xf32>
    %137 = arith.truncf %136 : vector<2x8x8xf32> to vector<2x8x8xbf16>
    %138 = vector.extract_strided_slice %52 {offsets = [0, 0, 24], sizes = [2, 8, 8], strides = [1, 1, 1]} : vector<2x8x32xbf16> to vector<2x8x8xbf16>
    "tpu.trace_start"() <{level = 10 : i32, message = "bqk,bkd->bqd"}> : () -> ()
    %cst_47 = arith.constant dense<0.000000e+00> : vector<2x8x8xf32>
    %139 = tpu.matmul %137, %138, %cst_47 {dimension_numbers = #tpu.dot_dimension_numbers<[2], [1], [1], [2], [0, 0, 0, 1, 1, 2], [0], [0]>} : vector<2x8x8xbf16>, vector<2x8x8xbf16>, vector<2x8x8xf32> -> vector<2x8x8xf32>
    "tpu.trace_stop"() : () -> ()
    %c0_48 = arith.constant 0 : index
    %c0_49 = arith.constant 0 : index
    %c24 = arith.constant 24 : index
    %140 = vector.load %arg17[%c0_48, %c0_49, %c24] : memref<2x8x32xf32, #tpu.memory_space<vmem>>, vector<2x8x8xf32>
    tpu.vector_store %arg17[%c0_48, %c0_49, %c24], %139 {strides = array<i32>} : memref<2x8x32xf32, #tpu.memory_space<vmem>>, vector<2x8x8xf32>,
    %c0_50 = arith.constant 0 : index
    %c0_51 = arith.constant 0 : index
    %c0_52 = arith.constant 0 : index
    %141 = vector.load %arg17[%c0_50, %c0_51, %c0_52] : memref<2x8x32xf32, #tpu.memory_space<vmem>>, vector<2x8x32xf32>
    %142 = vector.shape_cast %141 : vector<2x8x32xf32> to vector<16x32xf32>
    %143 = arith.truncf %142 : vector<16x32xf32> to vector<16x32xbf16>
    %c0_53 = arith.constant 0 : index
    %c0_54 = arith.constant 0 : index
    %c0_55 = arith.constant 0 : index
    %144 = vector.load %arg8[%c0_53, %c0_54, %c0_55] : memref<1x32x32xbf16, #tpu.memory_space<vmem>>, vector<1x32x32xbf16>
    %145 = vector.shape_cast %144 : vector<1x32x32xbf16> to vector<32x32xbf16>
    %cst_56 = arith.constant dense<0.000000e+00> : vector<16x32xf32>
    %146 = tpu.matmul %143, %145, %cst_56 {dimension_numbers = #tpu.dot_dimension_numbers<[1], [0], [0], [1], [0, 0, 1, 1], [], []>} : vector<16x32xbf16>, vector<32x32xbf16>, vector<16x32xf32> -> vector<16x32xf32>
    %c0_57 = arith.constant 0 : index
    %c0_58 = arith.constant 0 : index
    %c0_59 = arith.constant 0 : index
    %147 = vector.load %arg9[%c0_57, %c0_58, %c0_59] : memref<1x1x32xf32, #tpu.memory_space<vmem>>, vector<1x1x32xf32>
    %148 = vector.shape_cast %147 : vector<1x1x32xf32> to vector<1x32xf32>
    %149 = vector.broadcast %148 : vector<1x32xf32> to vector<16x32xf32>
    %150 = arith.addf %146, %149 : vector<16x32xf32>
    %151 = arith.addf %9, %150 : vector<16x32xf32>
    %c0_60 = arith.constant 0 : index
    %c0_61 = arith.constant 0 : index
    %c0_62 = arith.constant 0 : index
    %152 = vector.load %arg10[%c0_60, %c0_61, %c0_62] : memref<1x1x32xf32, #tpu.memory_space<vmem>>, vector<1x1x32xf32>
    %153 = vector.shape_cast %152 : vector<1x1x32xf32> to vector<1x32xf32>
    %c0_63 = arith.constant 0 : index
    %c0_64 = arith.constant 0 : index
    %c0_65 = arith.constant 0 : index
    %154 = vector.load %arg11[%c0_63, %c0_64, %c0_65] : memref<1x1x32xf32, #tpu.memory_space<vmem>>, vector<1x1x32xf32>
    %155 = vector.shape_cast %154 : vector<1x1x32xf32> to vector<1x32xf32>
    %cst_66 = arith.constant dense<0.000000e+00> : vector<16xf32>
    %156 = vector.multi_reduction <add>, %151, %cst_66 [1] : vector<16x32xf32> to vector<16xf32>
    %157 = vector.shape_cast %156 : vector<16xf32> to vector<16x1xf32>
    %cst_67 = arith.constant 3.200000e+01 : f32
    %158 = vector.broadcast %cst_67 : f32 to vector<16x1xf32>
    %159 = arith.divf %157, %158 : vector<16x1xf32>
    %160 = vector.broadcast %159 : vector<16x1xf32> to vector<16x32xf32>
    %161 = arith.subf %151, %160 : vector<16x32xf32>
    %162 = arith.mulf %161, %161 : vector<16x32xf32>
    %cst_68 = arith.constant dense<0.000000e+00> : vector<16xf32>
    %163 = vector.multi_reduction <add>, %162, %cst_68 [1] : vector<16x32xf32> to vector<16xf32>
    %164 = vector.shape_cast %163 : vector<16xf32> to vector<16x1xf32>
    %cst_69 = arith.constant 3.200000e+01 : f32
    %165 = vector.broadcast %cst_69 : f32 to vector<16x1xf32>
    %166 = arith.divf %164, %165 : vector<16x1xf32>
    %167 = vector.broadcast %159 : vector<16x1xf32> to vector<16x32xf32>
    %168 = arith.subf %151, %167 : vector<16x32xf32>
    %cst_70 = arith.constant 9.99999974E-6 : f32
    %169 = vector.broadcast %cst_70 : f32 to vector<16x1xf32>
    %170 = arith.addf %166, %169 : vector<16x1xf32>
    %171 = math.rsqrt %170 : vector<16x1xf32>
    %172 = vector.broadcast %171 : vector<16x1xf32> to vector<16x32xf32>
    %173 = arith.mulf %168, %172 : vector<16x32xf32>
    %174 = vector.broadcast %153 : vector<1x32xf32> to vector<16x32xf32>
    %175 = arith.mulf %173, %174 : vector<16x32xf32>
    %176 = vector.broadcast %155 : vector<1x32xf32> to vector<16x32xf32>
    %177 = arith.addf %175, %176 : vector<16x32xf32>
    %178 = arith.truncf %177 : vector<16x32xf32> to vector<16x32xbf16>
    %c0_71 = arith.constant 0 : index
    %c0_72 = arith.constant 0 : index
    %c0_73 = arith.constant 0 : index
    %179 = vector.load %arg12[%c0_71, %c0_72, %c0_73] : memref<1x32x128xbf16, #tpu.memory_space<vmem>>, vector<1x32x128xbf16>
    %180 = vector.shape_cast %179 : vector<1x32x128xbf16> to vector<32x128xbf16>
    %cst_74 = arith.constant dense<0.000000e+00> : vector<16x128xf32>
    %181 = tpu.matmul %178, %180, %cst_74 {dimension_numbers = #tpu.dot_dimension_numbers<[1], [0], [0], [1], [0, 0, 1, 1], [], []>} : vector<16x32xbf16>, vector<32x128xbf16>, vector<16x128xf32> -> vector<16x128xf32>
    %c0_75 = arith.constant 0 : index
    %c0_76 = arith.constant 0 : index
    %c0_77 = arith.constant 0 : index
    %182 = vector.load %arg13[%c0_75, %c0_76, %c0_77] : memref<1x1x128xf32, #tpu.memory_space<vmem>>, vector<1x1x128xf32>
    %183 = vector.shape_cast %182 : vector<1x1x128xf32> to vector<1x128xf32>
    %184 = vector.broadcast %183 : vector<1x128xf32> to vector<16x128xf32>
    %185 = arith.addf %181, %184 : vector<16x128xf32>
    %cst_78 = arith.constant 1.702000e+00 : f32
    %186 = vector.broadcast %cst_78 : f32 to vector<16x128xf32>
    %187 = arith.mulf %186, %185 : vector<16x128xf32>
    %188 = arith.truncf %187 : vector<16x128xf32> to vector<16x128xbf16>
    %189 = arith.negf %188 : vector<16x128xbf16>
    %190 = math.exp %189 : vector<16x128xbf16>
    %cst_79 = arith.constant 1.000000e+00 : bf16
    %191 = vector.broadcast %cst_79 : bf16 to vector<16x128xbf16>
    %192 = arith.addf %191, %190 : vector<16x128xbf16>
    %193 = arith.divf %191, %192 : vector<16x128xbf16>
    %194 = arith.extf %193 : vector<16x128xbf16> to vector<16x128xf32>
    %195 = arith.mulf %185, %194 : vector<16x128xf32>
    %196 = arith.truncf %195 : vector<16x128xf32> to vector<16x128xbf16>
    %c0_80 = arith.constant 0 : index
    %c0_81 = arith.constant 0 : index
    %c0_82 = arith.constant 0 : index
    %197 = vector.load %arg14[%c0_80, %c0_81, %c0_82] : memref<1x128x32xbf16, #tpu.memory_space<vmem>>, vector<1x128x32xbf16>
    %198 = vector.shape_cast %197 : vector<1x128x32xbf16> to vector<128x32xbf16>
    %cst_83 = arith.constant dense<0.000000e+00> : vector<16x32xf32>
    %199 = tpu.matmul %196, %198, %cst_83 {dimension_numbers = #tpu.dot_dimension_numbers<[1], [0], [0], [1], [0, 0, 1, 1], [], []>} : vector<16x128xbf16>, vector<128x32xbf16>, vector<16x32xf32> -> vector<16x32xf32>
    %c0_84 = arith.constant 0 : index
    %c0_85 = arith.constant 0 : index
    %c0_86 = arith.constant 0 : index
    %200 = vector.load %arg15[%c0_84, %c0_85, %c0_86] : memref<1x1x32xf32, #tpu.memory_space<vmem>>, vector<1x1x32xf32>
    %201 = vector.shape_cast %200 : vector<1x1x32xf32> to vector<1x32xf32>
    %202 = vector.broadcast %201 : vector<1x32xf32> to vector<16x32xf32>
    %203 = arith.addf %199, %202 : vector<16x32xf32>
    %204 = arith.addf %151, %203 : vector<16x32xf32>
    %205 = vector.shape_cast %204 : vector<16x32xf32> to vector<2x8x32xf32>
    %c0_87 = arith.constant 0 : index
    %c0_88 = arith.constant 0 : index
    %c0_89 = arith.constant 0 : index
    %206 = vector.load %arg16[%c0_87, %c0_88, %c0_89] : memref<2x8x32xf32, #tpu.memory_space<vmem>>, vector<2x8x32xf32>
    tpu.vector_store %arg16[%c0_87, %c0_88, %c0_89], %205 {strides = array<i32>} : memref<2x8x32xf32, #tpu.memory_space<vmem>>, vector<2x8x32xf32>,
    return
  }
  func.func @transform_0(%arg0: i32, %arg1: i32) -> (i32, i32, i32) {
    %c1_i32 = arith.constant 1 : i32
    %0 = arith.subi %arg1, %c1_i32 : i32
    %c0_i32 = arith.constant 0 : i32
    %1 = arith.maxsi %0, %c0_i32 : i32
    %c1_i32_0 = arith.constant 1 : i32
    %2 = arith.minsi %1, %c1_i32_0 : i32
    %c0_i32_1 = arith.constant 0 : i32
    %c0_i32_2 = arith.constant 0 : i32
    %c0_i32_3 = arith.constant 0 : i32
    return %2, %c0_i32_1, %c0_i32_2 : i32, i32, i32
  }
  func.func @transform_1(%arg0: i32, %arg1: i32) -> (i32, i32, i32) {
    %c0_i32 = arith.constant 0 : i32
    %c0_i32_0 = arith.constant 0 : i32
    %c0_i32_1 = arith.constant 0 : i32
    return %arg0, %c0_i32, %c0_i32_0 : i32, i32, i32
  }
  func.func @transform_2(%arg0: i32, %arg1: i32) -> (i32, i32, i32) {
    %c0_i32 = arith.constant 0 : i32
    %c0_i32_0 = arith.constant 0 : i32
    %c0_i32_1 = arith.constant 0 : i32
    return %arg1, %c0_i32, %c0_i32_0 : i32, i32, i32
  }
  func.func @transform_3(%arg0: i32, %arg1: i32) -> (i32, i32, i32) {
    %c0_i32 = arith.constant 0 : i32
    %c0_i32_0 = arith.constant 0 : i32
    %c0_i32_1 = arith.constant 0 : i32
    return %arg1, %c0_i32, %c0_i32_0 : i32, i32, i32
  }
  func.func @transform_4(%arg0: i32, %arg1: i32) -> (i32, i32, i32) {
    %c0_i32 = arith.constant 0 : i32
    %c0_i32_0 = arith.constant 0 : i32
    %c0_i32_1 = arith.constant 0 : i32
    return %arg1, %c0_i32, %c0_i32_0 : i32, i32, i32
  }
  func.func @transform_5(%arg0: i32, %arg1: i32) -> (i32, i32, i32) {
    %c0_i32 = arith.constant 0 : i32
    %c0_i32_0 = arith.constant 0 : i32
    %c0_i32_1 = arith.constant 0 : i32
    return %arg1, %c0_i32, %c0_i32_0 : i32, i32, i32
  }
  func.func @transform_6(%arg0: i32, %arg1: i32) -> (i32, i32, i32) {
    %c0_i32 = arith.constant 0 : i32
    %c0_i32_0 = arith.constant 0 : i32
    %c0_i32_1 = arith.constant 0 : i32
    return %arg1, %c0_i32, %c0_i32_0 : i32, i32, i32
  }
  func.func @transform_7(%arg0: i32, %arg1: i32) -> (i32, i32, i32) {
    %c0_i32 = arith.constant 0 : i32
    %c0_i32_0 = arith.constant 0 : i32
    %c0_i32_1 = arith.constant 0 : i32
    return %arg1, %c0_i32, %c0_i32_0 : i32, i32, i32
  }
  func.func @transform_8(%arg0: i32, %arg1: i32) -> (i32, i32, i32) {
    %c0_i32 = arith.constant 0 : i32
    %c0_i32_0 = arith.constant 0 : i32
    %c0_i32_1 = arith.constant 0 : i32
    return %arg1, %c0_i32, %c0_i32_0 : i32, i32, i32
  }
  func.func @transform_9(%arg0: i32, %arg1: i32) -> (i32, i32, i32) {
    %c0_i32 = arith.constant 0 : i32
    %c0_i32_0 = arith.constant 0 : i32
    %c0_i32_1 = arith.constant 0 : i32
    return %arg1, %c0_i32, %c0_i32_0 : i32, i32, i32
  }
  func.func @transform_10(%arg0: i32, %arg1: i32) -> (i32, i32, i32) {
    %c0_i32 = arith.constant 0 : i32
    %c0_i32_0 = arith.constant 0 : i32
    %c0_i32_1 = arith.constant 0 : i32
    return %arg1, %c0_i32, %c0_i32_0 : i32, i32, i32
  }
  func.func @transform_11(%arg0: i32, %arg1: i32) -> (i32, i32, i32) {
    %c0_i32 = arith.constant 0 : i32
    %c0_i32_0 = arith.constant 0 : i32
    %c0_i32_1 = arith.constant 0 : i32
    return %arg1, %c0_i32, %c0_i32_0 : i32, i32, i32
  }
  func.func @transform_12(%arg0: i32, %arg1: i32) -> (i32, i32, i32) {
    %c0_i32 = arith.constant 0 : i32
    %c0_i32_0 = arith.constant 0 : i32
    %c0_i32_1 = arith.constant 0 : i32
    return %arg1, %c0_i32, %c0_i32_0 : i32, i32, i32
  }
  func.func @transform_13(%arg0: i32, %arg1: i32) -> (i32, i32, i32) {
    %c0_i32 = arith.constant 0 : i32
    %c0_i32_0 = arith.constant 0 : i32
    %c0_i32_1 = arith.constant 0 : i32
    return %arg1, %c0_i32, %c0_i32_0 : i32, i32, i32
  }
  func.func @transform_14(%arg0: i32, %arg1: i32) -> (i32, i32, i32) {
    %c0_i32 = arith.constant 0 : i32
    %c0_i32_0 = arith.constant 0 : i32
    %c0_i32_1 = arith.constant 0 : i32
    return %arg0, %c0_i32, %c0_i32_0 : i32, i32, i32
  }
}

</mosaic_0001>

<bundles_post_ra>
// kernel: tpu_custom_call.1
= control target key start
LH: loop header
LB: loop body
LE: loop exit
PB: predicated region body
PF: predicated region fallthrough
CT: control target
= control target key end

     0   :  { %s3218_s0 = inlined_call_operand.vmem [shape: f32[2,2,32], index: 0, kind: input, shape index: {}]   ;;  %s3219_s1 = inlined_call_operand.vmem [shape: bf16[2,8,32], index: 1, kind: input, shape index: {}]   ;;  %s3220_s2 = inlined_call_operand.vmem [shape: f32[3,1,32], index: 2, kind: input, shape index: {}]   ;;  %s3221_s3 = inlined_call_operand.vmem [shape: f32[3,1,32], index: 3, kind: input, shape index: {}]   ;;  %s3222_s4 = inlined_call_operand.vmem [shape: bf16[3,32,96], index: 4, kind: input, shape index: {}]   ;;  %s3223_s5 = inlined_call_operand.vmem [shape: f32[3,1,96], index: 5, kind: input, shape index: {}]   ;;  %s3224_s6 = inlined_call_operand.vmem [shape: bf16[3,32,32], index: 6, kind: input, shape index: {}]   ;;  %s3225_s7 = inlined_call_operand.vmem [shape: f32[3,1,32], index: 7, kind: input, shape index: {}]   ;;  %s3226_s8 = inlined_call_operand.vmem [shape: f32[3,1,32], index: 8, kind: input, shape index: {}]   ;;  %s3227_s9 = inlined_call_operand.vmem [shape: f32[3,1,32], index: 9, kind: input, shape index: {}]   ;;  %s3228_s10 = inlined_call_operand.vmem [shape: bf16[3,32,128], index: 10, kind: input, shape index: {}]   ;;  %s3229_s11 = inlined_call_operand.vmem [shape: f32[3,1,128], index: 11, kind: input, shape index: {}]   ;;  %s3230_s12 = inlined_call_operand.vmem [shape: bf16[3,128,32], index: 12, kind: input, shape index: {}]   ;;  %s3231_s13 = inlined_call_operand.vmem [shape: f32[3,1,32], index: 13, kind: input, shape index: {}]   ;;  %s3232_s14 = inlined_call_operand.hbm [shape: f32[2,8,32], index: 14, kind: output, shape index: {}]  }
   0x1   :  { %3235 = sst [smem:[#allocation9_spill]] %s3221_s3 }
   0x2   :  { %3236 = sst [smem:[#allocation10_spill]] %s3222_s4 }
   0x3   :  { %3237 = sst [smem:[#allocation11_spill]] %s3223_s5 }
   0x4   :  { %3238 = sst [smem:[#allocation12_spill]] %s3224_s6 }
   0x5   :  { %3239 = sst [smem:[#allocation13_spill]] %s3225_s7 }
   0x6   :  { %3240 = sst [smem:[#allocation14_spill]] %s3232_s14 }
   0x7   :  { %19 = vsyncpa [#allocation4], 0  ;;  %s2835_s29 = smov 0   ;;  %s2837_s30 = smov 0  }
   0x8   :  { %s2839_s15 = smov 0  }
   0x9 LB: > { %3241 = sst [smem:[#allocation6_spill]] %s2736_s30  ;;  %s34_s17 = sadd.s32 1, %s2736_s30  ;;  %s2740_s15 = sphi %s2839_s15, %s25_s15   ;;  %s2736_s30 = sphi %s2837_s30, %s3266_s30   ;;  %s2732_s29 = sphi %s2835_s29, %s3265_s29  }
   0xa   : > { %3242 = sst [smem:[#allocation7_spill]] %s2740_s15  ;;  %p35_p0 = scmp.ge.s32.totalorder %s34_s17, 3 }
   0xb   : > { %p2317_p1 = scmp.ge.s32.totalorder %s2740_s15, 1  ;;  %p559_p2 = scmp.lt.s32.totalorder %s2740_s15, 4 }
   0xc   : > { %s3268_s17 = smov (%p35_p0, %s34_s17), 0 }
   0xd   : > { %3243 = sst [smem:[#allocation8_spill]] %s3268_s17  ;;  %p560_p3 = pnand %p2317_p1, %p559_p2 }
   0xe   : > { %s2318_s18 = sadd.s32 (!%p560_p3), 4294967295, %s2732_s29  ;;  %p673_p4 = scmp.lt.s32.totalorder (!%p560_p3), %s2732_s29, 2 }
   0xf   : > { %563 = sbr.rel (%p560_p3) target bundleno = 4039 (0xfc7), region = 76  ;;  %p654_p5 = scmp.gt.s32.totalorder (!%p560_p3), %s2318_s18, 0 }
  0x10   : > { %p2319_p6 = scmp.lt.s32.totalorder (!%p560_p3), %s2318_s18, 1  ;;  %s3246_s4 = sld [smem:[#allocation10_spill]] (!%p560_p3) }
  0x11   : > { %s3247_s6 = sld [smem:[#allocation12_spill]] (!%p560_p3)  ;;  %p2333_p8 = scmp.ne.s32.totalorder (!%p560_p3), %s2732_s29, 0 }
  0x14   : > { %s2859_s19 = scalar_select %p673_p4, %s2732_s29, 2 }
  0x15   : > { %s3270_s18 = smov (!%p654_p5, %s2318_s18), 0 }
  0x16   : > { %s3272_s18 = smov (!%p2319_p6, %s3270_s18), 1  ;;  %s2386_s26 = sshll.u32 %s2859_s19, 4 }
  0x17   : > { %p658_p7 = scmp.lt.s32.totalorder %s3272_s18, 1  ;;  %s2877_s14 = scalar_lea.vmem %s3246_s4, %s2386_s26 }
  0x18   : > { %s2882_s22 = scalar_lea.vmem %s3247_s6, %s2386_s26  ;;  %s2899_s20 = scalar_lea.vmem %s3228_s10, %s2386_s26 }
  0x19   : > { %s3274_s18 = smov (!%p658_p7, %s3272_s18), 1  ;;  %s708_s7 = scalar_lea.vmem %s3229_s11, %s2859_s19 }
  0x1a   : > { %s2324_s17 = sshll.u32 %s3274_s18, 1  ;;  %s2389_s3 = sshll.u32 %s2859_s19, 6 }
  0x1b   : > { %s661_s23 = scalar_lea.vmem %s3218_s0, %s2324_s17  ;;  %s716_s16 = scalar_lea.vmem %s3231_s13, %s2859_s19 }
  0x1c   : > { %s2916_s30 = scalar_lea.vmem %s3230_s12, %s2389_s3  ;;  %723 = sbr.rel (%p2333_p8) target bundleno = 37 (0x25), region = 80 }
  0x21   : > { %v2391_v0 = vld [vmem:[%s3219_s1] sm:$0xff]   ;;  %vm728_vm0 = vcmask 261120  }
  0x22   : > { %v2392_v1 = vunpack.c.l.bf16 %v2391_v0  ;;  %v2393_v2 = vunpack.c.h.bf16 %v2391_v0 }
  0x24   : > { %729 = vst.msk [vmem:[#allocation3] sm:$0xff] %vm728_vm0, %v2392_v1  ;;  %730 = vst.msk [vmem:[#allocation3 + $0x8] sm:$0xff] %vm728_vm0, %v2393_v2 }
  0x25 PF: > { %p731_p9 = scmp.ge.s32.totalorder %s2732_s29, 1  ;;  %p732_p10 = scmp.le.s32.totalorder %s2732_s29, 2 }
  0x27   : > { %p733_p11 = pnand %p732_p10, %p731_p9 }
  0x29   : > { %736 = sbr.rel (%p733_p11) target bundleno = 48 (0x30), region = 84 }
  0x2e   : > { %v737_v3 = vld [vmem:[%s661_s23] sm:$0x3]  ;;  %vm738_vm1 = vcmask 254976  }
  0x2f   : > { %739 = vst.msk [vmem:[#allocation3 + $0x1] sm:$0x3] %vm738_vm1, %v737_v3  ;;  %740 = vst.msk [vmem:[#allocation3 + $0x9] sm:$0x3] %vm738_vm1, %v737_v3 }
  0x30 PF: > { %vm745_vm2 = vcmask 261120   ;;  %v2632_v18 = vld [vmem:[%s2877_s14 + $0x8] sm:$0xff]   ;;  %v2742_v19 = vmov 0.0   ;;  %vm2743_vm3 = vmmov 0   ;;  %v2633_v20 = vld [vmem:[%s2877_s14] sm:$0xff]   ;;  %s3249_s29 = scalar_lea.vmem %s3220_s2, %s2859_s19  ;;  %s3250_s27 = sld [smem:[#allocation9_spill]]  ;;  %v859_v51 = vlaneseq }
  0x31   : > { %2444 = vmatprep.subr.bf16.mxu0 %v2742_v19  ;;  %2448 = vmatprep.mubr.msk.bf16.mxu0 %vm2743_vm3, %v2742_v19  ;;  %v2334_v29 = vld [vmem:[%s3249_s29] ss:$0 sm:$0xff]  ;;  %s3252_s24 = sld [smem:[#allocation11_spill]]  ;;  %s2744_s15 = smov 96   ;;  %vm867_vm4 = vcmask 64512   ;;  %vm996_vm6 = vcmask 1043456  }
  0x32   : > { %2445 = vmatpush3.bf16.msra.mxu0 %v2632_v18  ;;  %2464 = vmatprep.subr.bf16.mxu1 %v2742_v19  ;;  %v860_v52 = vshrl.u32 %v859_v51, 7  ;;  %v862_v53 = vand.u32 127, %v859_v51  ;;  %s2745_s28 = smov 64   ;;  %s2746_s18 = smov 88   ;;  %vm1320_vm7 = vcmask 130112   ;;  %vm1553_vm8 = vcmask 195712  }
  0x33   : > { %2446 = vmatprep.subr.bf16.mxu0 %v2742_v19  ;;  %2466 = vmatprep.mubr.msk.bf16.mxu1 %vm2743_vm3, %v2742_v19  ;;  %s2747_s4 = smov 120   ;;  %s2748_s5 = smov 56   ;;  %vm1786_vm9 = vcmask 261312  }
  0x34   : > { %vm2982_vm5 = vcmp.le.s32.totalorder %v862_v53, %v860_v52  ;;  %s2749_s6 = smov 80   ;;  %s2750_s14 = smov 112  }
  0x35   : > { %s2751_s29 = smov 48   ;;  %s2752_s25 = smov 72  }
  0x36   : > { %v2924_v4 = vld [vmem:[#allocation3] sm:$0xff]  ;;  %v2926_v5 = vld [vmem:[#allocation3 + $0x8] sm:$0xff]  ;;  %2447 = vmatpush3.bf16.msra.mxu0 %v2633_v20  ;;  %s3251_s17 = scalar_lea.vmem %s3250_s27, %s2859_s19  ;;  %s2753_s26 = smov 104  }
  0x37   : > { %v746_v6 = vsel %vm745_vm2, %v2924_v4, 0.0  ;;  %v749_v7 = vsel %vm745_vm2, %v2926_v5, 0.0  ;;  %2452 = vmatprep.subr.bf16.mxu0 %v2742_v19  ;;  %v2335_v33 = vld [vmem:[%s3251_s17] ss:$0 sm:$0xff]  ;;  %s3253_s3 = scalar_lea.vmem %s3252_s24, %s2859_s19  ;;  %s2754_s27 = smov 40  }
  0x38   : > { %747 = vadd.xlane.f32.xlu0 %v746_v6  ;;  %v2336_v38 = vld [vmem:[%s3253_s3] ss:$0 sm:$0xff]  ;;  %s2755_s17 = smov 8   ;;  %s2756_s21 = smov 16  }
  0x39   : > { %s2757_s23 = smov 24   ;;  %s3256_s3 = sld [smem:[#allocation13_spill]] }
  0x3c   : > { %750 = vadd.xlane.f32.xlu0 %v749_v7 }
  0xc1   : > { %v748_v8 = vpop.xlane.xlu0 %747 }
  0xc2   : > { %v753_v9 = vmul.f32 0.03125, %v748_v8 }
  0xc4   : > { %v755_v10 = vsub.f32 %v2924_v4, %v753_v9 }
  0xc5   : > { %v751_v11 = vpop.xlane.xlu0 %750 }
  0xc6   : > { %v754_v12 = vmul.f32 0.03125, %v751_v11  ;;  %v757_v13 = vmul.f32 %v755_v10, %v755_v10 }
  0xc8   : > { %v756_v14 = vsub.f32 %v2926_v5, %v754_v12  ;;  %v759_v15 = vsel %vm745_vm2, %v757_v13, 0.0 }
  0xc9   : > { %760 = vadd.xlane.f32.xlu1 %v759_v15 }
  0xca   : > { %v758_v16 = vmul.f32 %v756_v14, %v756_v14 }
  0xcc   : > { %v762_v17 = vsel %vm745_vm2, %v758_v16, 0.0 }
  0xcd   : > { %763 = vadd.xlane.f32.xlu1 %v762_v17 }
 0x152   : > { %v761_v21 = vpop.xlane.xlu1 %760 }
 0x153   : > { %v765_v22 = vmul.f32 0.03125, %v761_v21 }
 0x155   : > { %v767_v23 = vadd.f32 1e-05, %v765_v22 }
 0x156   : > { %v764_v24 = vpop.xlane.xlu1 %763 }
 0x157   : > { %2646 = vrsqrt.f32 %v767_v23  ;;  %v766_v25 = vmul.f32 0.03125, %v764_v24 }
 0x159   : > { %v768_v26 = vadd.f32 1e-05, %v766_v25 }
 0x15b   : > { %2648 = vrsqrt.f32 %v768_v26 }
 0x164   : > { %v2647_v27 = vpop.eup %2646 }
 0x165   : > { %v771_v28 = vmul.f32 %v2647_v27, %v755_v10 }
 0x167   : > { %v779_v32 = vmul.f32 %v2334_v29, %v771_v28 }
 0x168   : > { %v2649_v30 = vpop.eup %2648 }
 0x169   : > { %v772_v31 = vmul.f32 %v2649_v30, %v756_v14  ;;  %v787_v35 = vadd.f32 %v2335_v33, %v779_v32 }
 0x16b   : > { %v780_v34 = vmul.f32 %v2334_v29, %v772_v31 }
 0x16d   : > { %v788_v36 = vadd.f32 %v2335_v33, %v780_v34 }
 0x16f   : > { %v789_v37 = vpack.c.bf16 %v788_v36, %v787_v35 }
 0x171   : > { %2449 = vmatmul.mubr.msk.bf16.vlgmr.msra.gmra.mxu0 %vm745_vm2, %v789_v37 }
 0x172   : > { %2454 = vmatprep.mubr.msk.bf16.mxu0 %vm2743_vm3, %v2742_v19 }
 0x231   : > { %v850_v39 = vpop.f32.mrf.mxu0 }
 0x232   : > { %v851_v40 = vadd.f32 %v2336_v38, %v850_v39 }
 0x233   : > { %v2450_v41 = vpop.f32.mrf.mxu0 }
 0x234   : > { %v2964_v42 = vpack.c.bf16 %v851_v40, %v851_v40 }
 0x235   : > { %v853_v43 = vpop.f32.mrf.mxu0 }
 0x236   : > { %v854_v44 = vadd.f32 %v2336_v38, %v853_v43  ;;  %865 = vrot.lane.b32.xlu0 %v2964_v42, %s2744_s15 }
 0x237   : > { %v2451_v45 = vpop.f32.mrf.mxu0 }
 0x238   : > { %v2967_v46 = vpack.c.bf16 %v854_v44, %v854_v44 }
 0x23a   : > { %915 = vrot.lane.b32.xlu1 %v2967_v46, %s2744_s15  ;;  %s3257_s15 = scalar_lea.vmem %s3256_s3, %s2859_s19 }
 0x2a8   : > { %v866_v47 = vpop.permute.xlu0 %865 }
 0x2a9   : > { %v872_v48 = vsel %vm867_vm4, %v866_v47, 0 }
 0x2aa   : > { %2453 = vmatpush3.bf16.xpose.msra.mxu0 %v872_v48 }
 0x2ab   : > { %2458 = vmatprep.subr.bf16.mxu0 %v2742_v19 }
 0x2ac   : > { %v916_v49 = vpop.permute.xlu1 %915 }
 0x2ad   : > { %v921_v50 = vsel %vm867_vm4, %v916_v49, 0 }
 0x2b1   : > { %2455 = vmatmul.mubr.msk.bf16.vlgmr.msra.gmra.mxu0 %vm867_vm4, %v2964_v42 }
 0x2b2   : > { %2459 = vmatpush3.bf16.xpose.msra.mxu0 %v921_v50  ;;  %2460 = vmatprep.mubr.msk.bf16.mxu0 %vm2743_vm3, %v2742_v19 }
 0x2b3   : > { %2470 = vmatprep.subr.bf16.mxu0 %v2742_v19 }
 0x2b9   : > { %2461 = vmatmul.mubr.msk.bf16.vlgmr.msra.gmra.mxu0 %vm867_vm4, %v2967_v46 }
 0x2ba   : > { %2472 = vmatprep.mubr.msk.bf16.mxu0 %vm2743_vm3, %v2742_v19 }
 0x371   : > { %v908_v55 = vpop.f32.mrf.mxu0 }
 0x372   : > { %v965_v56 = vsel %vm2982_vm5, %v908_v55, -1e+09 }
 0x373   : > { %v2456_v57 = vpop.f32.mrf.mxu0  ;;  %v967_v58 = vsel %vm867_vm4, %v965_v56, -inf }
 0x374   : > { %968 = vmax.xlane.f32.xlu1 %v967_v58 }
 0x375   : > { %v911_v59 = vpop.f32.mrf.mxu0 }
 0x377   : > { %v2457_v60 = vpop.f32.mrf.mxu0 }
 0x379   : > { %v957_v61 = vpop.f32.mrf.mxu0 }
 0x37a   : > { %v966_v62 = vsel %vm2982_vm5, %v957_v61, -1e+09 }
 0x37b   : > { %v2462_v63 = vpop.f32.mrf.mxu0  ;;  %v970_v0 = vsel %vm867_vm4, %v966_v62, -inf }
 0x37c   : > { %971 = vmax.xlane.f32.xlu0 %v970_v0 }
 0x37d   : > { %v960_v1 = vpop.f32.mrf.mxu0 }
 0x37f   : > { %v2463_v2 = vpop.f32.mrf.mxu0 }
 0x385   : > { %1040 = vrot.lane.b32.xlu1 %v2967_v46, %s2745_s28 }
 0x389   : > { %1092 = vrot.lane.b32.xlu1 %v2964_v42, %s2746_s18 }
 0x3fd   : > { %v969_v3 = vpop.xlane.xlu1 %968 }
 0x3fe   : > { %v973_v6 = vsub.f32 %v965_v56, %v969_v3 }
 0x400   : > { %v975_v7 = vmul.f32 1.442695, %v973_v6 }
 0x401   : > { %v1041_v8 = vpop.permute.xlu1 %1040 }
 0x402   : > { %2650 = vpow2.f32 %v975_v7  ;;  %v1046_v9 = vsel %vm996_vm6, %v1041_v8, 0 }
 0x403   : > { %2471 = vmatpush3.bf16.msra.mxu0 %v1046_v9 }
 0x404   : > { %2482 = vmatprep.subr.bf16.mxu0 %v2742_v19 }
 0x405   : > { %v972_v10 = vpop.xlane.xlu0 %971  ;;  %v1093_v18 = vpop.permute.xlu1 %1092 }
 0x406   : > { %v974_v11 = vsub.f32 %v966_v62, %v972_v10  ;;  %v1098_v26 = vsel %vm867_vm4, %v1093_v18, 0 }
 0x408   : > { %v977_v12 = vmul.f32 1.442695, %v974_v11 }
 0x40a   : > { %2652 = vpow2.f32 %v977_v12 }
 0x40f   : > { %v2651_v13 = vpop.eup %2650 }
 0x410   : > { %v979_v14 = vsel %vm867_vm4, %v2651_v13, 0.0 }
 0x411   : > { %980 = vadd.xlane.f32.xlu0 %v979_v14 }
 0x417   : > { %v2653_v15 = vpop.eup %2652 }
 0x418   : > { %v982_v16 = vsel %vm867_vm4, %v2653_v15, 0.0 }
 0x419   : > { %983 = vadd.xlane.f32.xlu1 %v982_v16 }
 0x427   : > { %991 = vrot.lane.b32.xlu0 %v2964_v42, %s2745_s28 }
 0x42a   : > { %1142 = vrot.lane.b32.xlu1 %v2967_v46, %s2746_s18 }
 0x42b   : > { %1090 = vrot.lane.b32.xlu0 %v2964_v42, %s2747_s4 }
 0x42e   : > { %1140 = vrot.lane.b32.xlu1 %v2967_v46, %s2747_s4 }
 0x49a   : > { %v981_v17 = vpop.xlane.xlu0 %980 }
 0x49b   : > { %2654 = vrcp.f32 %v981_v17 }
 0x49e   : > { %v992_v20 = vpop.permute.xlu0 %991 }
 0x49f   : > { %v998_v21 = vsel %vm996_vm6, %v992_v20, 0 }
 0x4a0   : > { %2465 = vmatpush3.bf16.msra.mxu1 %v998_v21 }
 0x4a1   : > { %2476 = vmatprep.subr.bf16.mxu1 %v2742_v19 }
 0x4a2   : > { %v984_v22 = vpop.xlane.xlu1 %983  ;;  %v1091_v31 = vpop.permute.xlu0 %1090 }
 0x4a3   : > { %2656 = vrcp.f32 %v984_v22 }
 0x4a6   : > { %v1143_v29 = vpop.permute.xlu1 %1142 }
 0x4a7   : > { %v1148_v32 = vsel %vm867_vm4, %v1143_v29, 0 }
 0x4a8   : > { %v2655_v23 = vpop.eup %2654 }
 0x4a9   : > { %v987_v24 = vmul.f32 %v2655_v23, %v2651_v13 }
 0x4aa   : > { %v1141_v33 = vpop.permute.xlu1 %1140 }
 0x4ab   : > { %v989_v25 = vpack.c.bf16 %v987_v24, %v987_v24 }
 0x4ad   : > { %2467 = vmatmul.mubr.msk.bf16.vlgmr.msra.gmra.mxu1 %vm867_vm4, %v989_v25 }
 0x4ae   : > { %2477 = vmatpush3.bf16.xpose.msra.mxu1 %v1098_v26  ;;  %2478 = vmatprep.mubr.msk.bf16.mxu1 %vm2743_vm3, %v2742_v19 }
 0x4af   : > { %2488 = vmatprep.subr.bf16.mxu1 %v2742_v19 }
 0x4b0   : > { %v2657_v27 = vpop.eup %2656 }
 0x4b1   : > { %v988_v28 = vmul.f32 %v2657_v27, %v2653_v15 }
 0x4b3   : > { %v990_v30 = vpack.c.bf16 %v988_v28, %v988_v28 }
 0x4b5   : > { %2473 = vmatmul.mubr.msk.bf16.vlgmr.msra.gmra.mxu0 %vm867_vm4, %v990_v30  ;;  %2479 = vmatmul.mubr.msk.bf16.vlgmr.msra.gmra.mxu1 %vm867_vm4, %v1091_v31 }
 0x4b6   : > { %2483 = vmatpush3.bf16.xpose.msra.mxu0 %v1148_v32  ;;  %2484 = vmatprep.mubr.msk.bf16.mxu0 %vm2743_vm3, %v2742_v19 }
 0x4b7   : > { %2494 = vmatprep.subr.bf16.mxu0 %v2742_v19  ;;  %2490 = vmatprep.mubr.msk.bf16.mxu1 %vm2743_vm3, %v2742_v19 }
 0x4bd   : > { %2485 = vmatmul.mubr.msk.bf16.vlgmr.msra.gmra.mxu0 %vm867_vm4, %v1141_v33 }
 0x4be   : > { %2496 = vmatprep.mubr.msk.bf16.mxu0 %vm2743_vm3, %v2742_v19 }
 0x56d   : > { %v1034_v34 = vpop.f32.mrf.mxu1 }
 0x56e   : > { %1088 = vst.msk [vmem:[#allocation2] sm:$0xff] %vm867_vm4, %v1034_v34 }
 0x56f   : > { %v2468_v35 = vpop.f32.mrf.mxu1 }
 0x571   : > { %v1037_v36 = vpop.f32.mrf.mxu1 }
 0x573   : > { %v2469_v37 = vpop.f32.mrf.mxu1 }
 0x575   : > { %v1082_v38 = vpop.f32.mrf.mxu0  ;;  %v1134_v39 = vpop.f32.mrf.mxu1 }
 0x576   : > { %1089 = vst.msk [vmem:[#allocation2 + $0x8] sm:$0xff] %vm867_vm4, %v1082_v38  ;;  %v1190_v40 = vsel %vm2982_vm5, %v1134_v39, -1e+09 }
 0x577   : > { %v2474_v41 = vpop.f32.mrf.mxu0  ;;  %v2480_v43 = vpop.f32.mrf.mxu1  ;;  %v1192_v44 = vsel %vm867_vm4, %v1190_v40, -inf }
 0x578   : > { %1193 = vmax.xlane.f32.xlu0 %v1192_v44 }
 0x579   : > { %v1085_v45 = vpop.f32.mrf.mxu0  ;;  %v1137_v47 = vpop.f32.mrf.mxu1 }
 0x57b   : > { %v2475_v48 = vpop.f32.mrf.mxu0  ;;  %v2481_v49 = vpop.f32.mrf.mxu1 }
 0x57d   : > { %v1184_v50 = vpop.f32.mrf.mxu0 }
 0x57e   : > { %v1191_v51 = vsel %vm2982_vm5, %v1184_v50, -1e+09 }
 0x57f   : > { %v2486_v52 = vpop.f32.mrf.mxu0  ;;  %v1195_v53 = vsel %vm867_vm4, %v1191_v51, -inf }
 0x580   : > { %1196 = vmax.xlane.f32.xlu1 %v1195_v53 }
 0x581   : > { %v1187_v55 = vpop.f32.mrf.mxu0 }
 0x583   : > { %v2487_v56 = vpop.f32.mrf.mxu0 }
 0x591   : > { %1264 = vrot.lane.b32.xlu1 %v2967_v46, %s2748_s5 }
 0x595   : > { %1325 = vrot.lane.b32.xlu1 %v2964_v42, %s2749_s6 }
 0x599   : > { %1375 = vrot.lane.b32.xlu1 %v2967_v46, %s2749_s6  ;;  %s3259_s6 = scalar_lea.vmem %s3227_s9, %s2859_s19 }
 0x59d   : > { %1373 = vrot.lane.b32.xlu1 %v2967_v46, %s2750_s14 }
 0x601   : > { %v1194_v57 = vpop.xlane.xlu0 %1193 }
 0x602   : > { %v1198_v58 = vsub.f32 %v1190_v40, %v1194_v57 }
 0x604   : > { %v1200_v59 = vmul.f32 1.442695, %v1198_v58 }
 0x606   : > { %2658 = vpow2.f32 %v1200_v59 }
 0x609   : > { %v1197_v60 = vpop.xlane.xlu1 %1196 }
 0x60a   : > { %v1199_v61 = vsub.f32 %v1191_v51, %v1197_v60 }
 0x60c   : > { %v1202_v62 = vmul.f32 1.442695, %v1199_v61 }
 0x60d   : > { %v1265_v63 = vpop.permute.xlu1 %1264 }
 0x60e   : > { %2660 = vpow2.f32 %v1202_v62  ;;  %v1270_v0 = vsel %vm996_vm6, %v1265_v63, 0 }
 0x60f   : > { %2495 = vmatpush3.bf16.msra.mxu0 %v1270_v0 }
 0x610   : > { %2506 = vmatprep.subr.bf16.mxu0 %v2742_v19 }
 0x611   : > { %v1326_v13 = vpop.permute.xlu1 %1325 }
 0x612   : > { %v1331_v15 = vsel %vm867_vm4, %v1326_v13, 0 }
 0x613   : > { %v2659_v1 = vpop.eup %2658 }
 0x614   : > { %v1204_v2 = vsel %vm867_vm4, %v2659_v1, 0.0 }
 0x615   : > { %1205 = vadd.xlane.f32.xlu0 %v1204_v2  ;;  %v1376_v18 = vpop.permute.xlu1 %1375 }
 0x616   : > { %v1381_v22 = vsel %vm867_vm4, %v1376_v18, 0 }
 0x619   : > { %v1374_v23 = vpop.permute.xlu1 %1373 }
 0x61b   : > { %v2661_v3 = vpop.eup %2660 }
 0x61c   : > { %v1207_v6 = vsel %vm867_vm4, %v2661_v3, 0.0 }
 0x61d   : > { %1208 = vadd.xlane.f32.xlu0 %v1207_v6 }
 0x633   : > { %1216 = vrot.lane.b32.xlu0 %v2964_v42, %s2748_s5 }
 0x637   : > { %1323 = vrot.lane.b32.xlu0 %v2964_v42, %s2750_s14 }
 0x69e   : > { %v1206_v7 = vpop.xlane.xlu0 %1205 }
 0x69f   : > { %2662 = vrcp.f32 %v1206_v7 }
 0x6a6   : > { %v1209_v8 = vpop.xlane.xlu0 %1208 }
 0x6a7   : > { %2664 = vrcp.f32 %v1209_v8 }
 0x6aa   : > { %v1217_v9 = vpop.permute.xlu0 %1216 }
 0x6ab   : > { %v1222_v10 = vsel %vm996_vm6, %v1217_v9, 0 }
 0x6ac   : > { %v2663_v11 = vpop.eup %2662  ;;  %2489 = vmatpush3.bf16.msra.mxu1 %v1222_v10 }
 0x6ad   : > { %2500 = vmatprep.subr.bf16.mxu1 %v2742_v19  ;;  %v1212_v12 = vmul.f32 %v2663_v11, %v2659_v1 }
 0x6ae   : > { %v1324_v21 = vpop.permute.xlu0 %1323 }
 0x6af   : > { %v1214_v14 = vpack.c.bf16 %v1212_v12, %v1212_v12 }
 0x6b1   : > { %2491 = vmatmul.mubr.msk.bf16.vlgmr.msra.gmra.mxu1 %vm867_vm4, %v1214_v14 }
 0x6b2   : > { %2501 = vmatpush3.bf16.xpose.msra.mxu1 %v1331_v15  ;;  %2502 = vmatprep.mubr.msk.bf16.mxu1 %vm2743_vm3, %v2742_v19 }
 0x6b3   : > { %2512 = vmatprep.subr.bf16.mxu1 %v2742_v19 }
 0x6b4   : > { %v2665_v16 = vpop.eup %2664 }
 0x6b5   : > { %v1213_v17 = vmul.f32 %v2665_v16, %v2661_v3 }
 0x6b7   : > { %v1215_v20 = vpack.c.bf16 %v1213_v17, %v1213_v17 }
 0x6b9   : > { %2497 = vmatmul.mubr.msk.bf16.vlgmr.msra.gmra.mxu0 %vm867_vm4, %v1215_v20  ;;  %2503 = vmatmul.mubr.msk.bf16.vlgmr.msra.gmra.mxu1 %vm867_vm4, %v1324_v21 }
 0x6ba   : > { %2507 = vmatpush3.bf16.xpose.msra.mxu0 %v1381_v22  ;;  %2508 = vmatprep.mubr.msk.bf16.mxu0 %vm2743_vm3, %v2742_v19 }
 0x6bb   : > { %2518 = vmatprep.subr.bf16.mxu0 %v2742_v19  ;;  %2514 = vmatprep.mubr.msk.bf16.mxu1 %vm2743_vm3, %v2742_v19 }
 0x6c1   : > { %2509 = vmatmul.mubr.msk.bf16.vlgmr.msra.gmra.mxu0 %vm867_vm4, %v1374_v23 }
 0x6c2   : > { %2520 = vmatprep.mubr.msk.bf16.mxu0 %vm2743_vm3, %v2742_v19 }
 0x771   : > { %v3056_v24 = vpop.f32.mrf.mxu1 }
 0x773   : > { %v2492_v25 = vpop.f32.mrf.mxu1 }
 0x775   : > { %v1261_v26 = vpop.f32.mrf.mxu1 }
 0x777   : > { %v2493_v27 = vpop.f32.mrf.mxu1 }
 0x779   : > { %v3058_v28 = vpop.f32.mrf.mxu0  ;;  %v1367_v29 = vpop.f32.mrf.mxu1 }
 0x77a   : > { %v1423_v30 = vsel %vm2982_vm5, %v1367_v29, -1e+09 }
 0x77b   : > { %v2498_v31 = vpop.f32.mrf.mxu0  ;;  %v2504_v32 = vpop.f32.mrf.mxu1  ;;  %v1425_v33 = vsel %vm867_vm4, %v1423_v30, -inf }
 0x77c   : > { %1426 = vmax.xlane.f32.xlu0 %v1425_v33 }
 0x77d   : > { %v1309_v34 = vpop.f32.mrf.mxu0  ;;  %v1370_v35 = vpop.f32.mrf.mxu1 }
 0x77f   : > { %v2499_v36 = vpop.f32.mrf.mxu0  ;;  %v2505_v37 = vpop.f32.mrf.mxu1 }
 0x781   : > { %v1417_v38 = vpop.f32.mrf.mxu0 }
 0x782   : > { %v1424_v39 = vsel %vm2982_vm5, %v1417_v38, -1e+09 }
 0x783   : > { %v2510_v40 = vpop.f32.mrf.mxu0  ;;  %v1428_v41 = vsel %vm867_vm4, %v1424_v39, -inf }
 0x784   : > { %1429 = vmax.xlane.f32.xlu1 %v1428_v41 }
 0x785   : > { %v1420_v43 = vpop.f32.mrf.mxu0 }
 0x787   : > { %v2511_v44 = vpop.f32.mrf.mxu0 }
 0x795   : > { %1497 = vrot.lane.b32.xlu1 %v2967_v46, %s2751_s29 }
 0x799   : > { %1558 = vrot.lane.b32.xlu1 %v2964_v42, %s2752_s25 }
 0x79d   : > { %1608 = vrot.lane.b32.xlu1 %v2967_v46, %s2752_s25 }
 0x7a1   : > { %1606 = vrot.lane.b32.xlu1 %v2967_v46, %s2753_s26 }
 0x805   : > { %v1427_v45 = vpop.xlane.xlu0 %1426 }
 0x806   : > { %v1431_v47 = vsub.f32 %v1423_v30, %v1427_v45 }
 0x808   : > { %v1433_v48 = vmul.f32 1.442695, %v1431_v47 }
 0x80a   : > { %2666 = vpow2.f32 %v1433_v48 }
 0x80d   : > { %v1430_v49 = vpop.xlane.xlu1 %1429 }
 0x80e   : > { %v1432_v50 = vsub.f32 %v1424_v39, %v1430_v49 }
 0x810   : > { %v1435_v51 = vmul.f32 1.442695, %v1432_v50 }
 0x811   : > { %v1498_v52 = vpop.permute.xlu1 %1497 }
 0x812   : > { %2668 = vpow2.f32 %v1435_v51  ;;  %v1503_v53 = vsel %vm996_vm6, %v1498_v52, 0 }
 0x813   : > { %2519 = vmatpush3.bf16.msra.mxu0 %v1503_v53 }
 0x814   : > { %2530 = vmatprep.subr.bf16.mxu0 %v2742_v19 }
 0x815   : > { %v1559_v1 = vpop.permute.xlu1 %1558 }
 0x816   : > { %v1564_v3 = vsel %vm867_vm4, %v1559_v1, 0 }
 0x817   : > { %v2667_v55 = vpop.eup %2666 }
 0x818   : > { %v1437_v56 = vsel %vm867_vm4, %v2667_v55, 0.0 }
 0x819   : > { %1438 = vadd.xlane.f32.xlu0 %v1437_v56  ;;  %v1609_v8 = vpop.permute.xlu1 %1608 }
 0x81a   : > { %v1614_v11 = vsel %vm867_vm4, %v1609_v8, 0 }
 0x81d   : > { %v1607_v12 = vpop.permute.xlu1 %1606 }
 0x81f   : > { %v2669_v57 = vpop.eup %2668 }
 0x820   : > { %v1440_v58 = vsel %vm867_vm4, %v2669_v57, 0.0 }
 0x821   : > { %1441 = vadd.xlane.f32.xlu0 %v1440_v58 }
 0x837   : > { %1449 = vrot.lane.b32.xlu0 %v2964_v42, %s2751_s29 }
 0x83b   : > { %1556 = vrot.lane.b32.xlu0 %v2964_v42, %s2753_s26  ;;  %s2758_s26 = smov [#allocation3]  }
 0x8a2   : > { %v1439_v59 = vpop.xlane.xlu0 %1438 }
 0x8a3   : > { %2670 = vrcp.f32 %v1439_v59 }
 0x8aa   : > { %v1442_v60 = vpop.xlane.xlu0 %1441 }
 0x8ab   : > { %2672 = vrcp.f32 %v1442_v60  ;;  %v2634_v60 = vld [vmem:[%s2882_s22 + $0x8] sm:$0xff]  }
 0x8ae   : > { %v1450_v61 = vpop.permute.xlu0 %1449 }
 0x8af   : > { %v1455_v62 = vsel %vm996_vm6, %v1450_v61, 0  ;;  %v2635_v61 = vld [vmem:[%s2882_s22] sm:$0xff]  }
 0x8b0   : > { %v2671_v63 = vpop.eup %2670  ;;  %2513 = vmatpush3.bf16.msra.mxu1 %v1455_v62 }
 0x8b1   : > { %2524 = vmatprep.subr.bf16.mxu1 %v2742_v19  ;;  %v1445_v0 = vmul.f32 %v2671_v63, %v2667_v55 }
 0x8b2   : > { %v1557_v10 = vpop.permute.xlu0 %1556 }
 0x8b3   : > { %v1447_v2 = vpack.c.bf16 %v1445_v0, %v1445_v0 }
 0x8b5   : > { %2515 = vmatmul.mubr.msk.bf16.vlgmr.msra.gmra.mxu1 %vm867_vm4, %v1447_v2 }
 0x8b6   : > { %2525 = vmatpush3.bf16.xpose.msra.mxu1 %v1564_v3  ;;  %2526 = vmatprep.mubr.msk.bf16.mxu1 %vm2743_vm3, %v2742_v19 }
 0x8b7   : > { %2536 = vmatprep.subr.bf16.mxu1 %v2742_v19 }
 0x8b8   : > { %v2673_v6 = vpop.eup %2672 }
 0x8b9   : > { %v1446_v7 = vmul.f32 %v2673_v6, %v2669_v57 }
 0x8bb   : > { %v1448_v9 = vpack.c.bf16 %v1446_v7, %v1446_v7 }
 0x8bd   : > { %2521 = vmatmul.mubr.msk.bf16.vlgmr.msra.gmra.mxu0 %vm867_vm4, %v1448_v9  ;;  %2527 = vmatmul.mubr.msk.bf16.vlgmr.msra.gmra.mxu1 %vm867_vm4, %v1557_v10 }
 0x8be   : > { %2531 = vmatpush3.bf16.xpose.msra.mxu0 %v1614_v11  ;;  %2532 = vmatprep.mubr.msk.bf16.mxu0 %vm2743_vm3, %v2742_v19 }
 0x8bf   : > { %2542 = vmatprep.subr.bf16.mxu0 %v2742_v19  ;;  %2538 = vmatprep.mubr.msk.bf16.mxu1 %vm2743_vm3, %v2742_v19 }
 0x8c5   : > { %2533 = vmatmul.mubr.msk.bf16.vlgmr.msra.gmra.mxu0 %vm867_vm4, %v1607_v12 }
 0x8c6   : > { %2544 = vmatprep.mubr.msk.bf16.mxu0 %vm2743_vm3, %v2742_v19 }
 0x975   : > { %v1491_v13 = vpop.f32.mrf.mxu1 }
 0x977   : > { %v2516_v14 = vpop.f32.mrf.mxu1 }
 0x979   : > { %v1494_v15 = vpop.f32.mrf.mxu1 }
 0x97b   : > { %v2517_v16 = vpop.f32.mrf.mxu1 }
 0x97d   : > { %v1539_v17 = vpop.f32.mrf.mxu0  ;;  %v1600_v18 = vpop.f32.mrf.mxu1 }
 0x97e   : > { %v1656_v20 = vsel %vm2982_vm5, %v1600_v18, -1e+09 }
 0x97f   : > { %v2522_v21 = vpop.f32.mrf.mxu0  ;;  %v2528_v22 = vpop.f32.mrf.mxu1  ;;  %v1658_v23 = vsel %vm867_vm4, %v1656_v20, -inf }
 0x980   : > { %1659 = vmax.xlane.f32.xlu0 %v1658_v23 }
 0x981   : > { %v1542_v25 = vpop.f32.mrf.mxu0  ;;  %v1603_v26 = vpop.f32.mrf.mxu1 }
 0x983   : > { %v2523_v27 = vpop.f32.mrf.mxu0  ;;  %v2529_v29 = vpop.f32.mrf.mxu1 }
 0x985   : > { %v1650_v30 = vpop.f32.mrf.mxu0 }
 0x986   : > { %v1657_v31 = vsel %vm2982_vm5, %v1650_v30, -1e+09 }
 0x987   : > { %v2534_v32 = vpop.f32.mrf.mxu0  ;;  %v1661_v33 = vsel %vm867_vm4, %v1657_v31, -inf }
 0x988   : > { %1662 = vmax.xlane.f32.xlu1 %v1661_v33 }
 0x989   : > { %v1653_v34 = vpop.f32.mrf.mxu0 }
 0x98b   : > { %v2535_v35 = vpop.f32.mrf.mxu0 }
 0x98c   : > { %v2636_v35 = vld [vmem:[%s2899_s20 + $0x8] sm:$0xff]  }
 0x999   : > { %1730 = vrot.lane.b32.xlu1 %v2967_v46, %s2754_s27 }
 0x99d   : > { %1314 = vrot.lane.b32.xlu1 %v3056_v24, %s2755_s17 }
 0x9a1   : > { %1316 = vrot.lane.b32.xlu1 %v3058_v28, %s2755_s17 }
 0x9a5   : > { %1549 = vrot.lane.b32.xlu1 %v1539_v17, %s2756_s21 }
 0xa09   : > { %v1660_v54 = vpop.xlane.xlu0 %1659 }
 0xa0a   : > { %v1664_v36 = vsub.f32 %v1656_v20, %v1660_v54  ;;  %v2637_v54 = vld [vmem:[%s2899_s20] sm:$0xff]   ;;  %s3258_s20 = scalar_lea.vmem %s3226_s8, %s2859_s19 }
 0xa0c   : > { %v1666_v37 = vmul.f32 1.442695, %v1664_v36 }
 0xa0e   : > { %2674 = vpow2.f32 %v1666_v37 }
 0xa11   : > { %v1663_v38 = vpop.xlane.xlu1 %1662 }
 0xa12   : > { %v1665_v39 = vsub.f32 %v1657_v31, %v1663_v38 }
 0xa14   : > { %v1668_v40 = vmul.f32 1.442695, %v1665_v39 }
 0xa15   : > { %v1731_v41 = vpop.permute.xlu1 %1730 }
 0xa16   : > { %2676 = vpow2.f32 %v1668_v40  ;;  %v1736_v46 = vsel %vm996_vm6, %v1731_v41, 0 }
 0xa17   : > { %2543 = vmatpush3.bf16.msra.mxu0 %v1736_v46 }
 0xa18   : > { %2556 = vmatprep.subr.bf16.mxu0 %v2742_v19 }
 0xa19   : > { %v1315_v24 = vpop.permute.xlu1 %1314 }
 0xa1a   : > { %1321 = vst.msk [vmem:[#allocation2] sm:$0xff] %vm1320_vm7, %v1315_v24 }
 0xa1b   : > { %v2675_v28 = vpop.eup %2674 }
 0xa1c   : > { %v1670_v43 = vsel %vm867_vm4, %v2675_v28, 0.0 }
 0xa1d   : > { %1671 = vadd.xlane.f32.xlu0 %v1670_v43  ;;  %v1317_v44 = vpop.permute.xlu1 %1316 }
 0xa1e   : > { %1322 = vst.msk [vmem:[#allocation2 + $0x8] sm:$0xff] %vm1320_vm7, %v1317_v44 }
 0xa21   : > { %v1550_v45 = vpop.permute.xlu1 %1549 }
 0xa22   : > { %1555 = vst.msk [vmem:[#allocation2 + $0x8] sm:$0xff] %vm1553_vm8, %v1550_v45 }
 0xa23   : > { %v2677_v47 = vpop.eup %2676 }
 0xa24   : > { %v1673_v48 = vsel %vm867_vm4, %v2677_v47, 0.0 }
 0xa25   : > { %1674 = vadd.xlane.f32.xlu0 %v1673_v48 }
 0xa3b   : > { %1682 = vrot.lane.b32.xlu0 %v2964_v42, %s2754_s27  ;;  %s2113_s27 = sshll.u32 %s2758_s26, 4  ;;  %s2114_s27 = int_to_ptr.vmem [resolvable:$true] %s2113_s27 }
 0xa3c   : > { %s2690_s19 = scalar_lea.vmem %s2114_s27, 256  ;;  %p2697_p2 = scmp.lt.s32.totalorder %s2114_s27, %s2114_s27 }
 0xa3d   : > { %p2691_p13 = scmp.ne.s32.totalorder %s2114_s27, %s2690_s19  ;;  %p2698_p3 = scmp.lt.s32.totalorder %s2690_s19, %s2690_s19 }
 0xa3f   : > { %1547 = vrot.lane.b32.xlu0 %v1491_v13, %s2756_s21  ;;  %v2356_v13 = vld [vmem:[%s3257_s15] ss:$0 sm:$0xff]  ;;  %p2699_p4 = por %p2698_p3, %p2697_p2 }
 0xaa6   : > { %v1672_v49 = vpop.xlane.xlu0 %1671 }
 0xaa7   : > { %2678 = vrcp.f32 %v1672_v49 }
 0xaae   : > { %v1675_v50 = vpop.xlane.xlu0 %1674 }
 0xaaf   : > { %2680 = vrcp.f32 %v1675_v50 }
 0xab2   : > { %v1683_v51 = vpop.permute.xlu0 %1682 }
 0xab3   : > { %v1688_v52 = vsel %vm996_vm6, %v1683_v51, 0 }
 0xab4   : > { %v2679_v53 = vpop.eup %2678  ;;  %2537 = vmatpush3.bf16.msra.mxu1 %v1688_v52  ;;  %v2638_v52 = vld [vmem:[%s2916_s30 + $0x38] sm:$0xff]  }
 0xab5   : > { %v1678_v55 = vmul.f32 %v2679_v53, %v2675_v28  ;;  %2548 = vmatprep.subr.bf16.mxu1 %v2742_v19  ;;  %v2360_v28 = vld [vmem:[%s3258_s20] ss:$0 sm:$0xff]  ;;  %v2639_v53 = vld [vmem:[%s2916_s30 + $0x30] sm:$0xff]  }
 0xab6   : > { %v1548_v56 = vpop.permute.xlu0 %1547 }
 0xab7   : > { %1554 = vst.msk [vmem:[#allocation2] sm:$0xff] %vm1553_vm8, %v1548_v56  ;;  %v1680_v57 = vpack.c.bf16 %v1678_v55, %v1678_v55  ;;  %v2640_v55 = vld [vmem:[%s2916_s30 + $0x28] sm:$0xff]   ;;  %v2641_v56 = vld [vmem:[%s2916_s30 + $0x20] sm:$0xff]  }
 0xab9   : > { %2539 = vmatmul.mubr.msk.bf16.vlgmr.msra.gmra.mxu1 %vm867_vm4, %v1680_v57  ;;  %v2642_v57 = vld [vmem:[%s2916_s30 + $0x18] sm:$0xff]  }
 0xaba   : > { %2552 = vmatprep.mubr.msk.bf16.mxu1 %vm2743_vm3, %v2742_v19  ;;  %2549 = vmatpush3.bf16.msra.mxu1 %v2634_v60  ;;  %v2362_v60 = vld [vmem:[%s708_s7] ss:$0 sm:$0xff]  ;;  %s3260_s7 = sld [smem:[#allocation7_spill]] }
 0xabb   : > { %2550 = vmatprep.subr.bf16.mxu1 %v2742_v19 }
 0xabc   : > { %v2681_v42 = vpop.eup %2680 }
 0xabd   : > { %v1679_v58 = vmul.f32 %v2681_v42, %v2677_v47  ;;  %v2361_v47 = vld [vmem:[%s3259_s6] ss:$0 sm:$0xff]  ;;  %v2643_v42 = vld [vmem:[%s2916_s30 + $0x10] sm:$0xff]  }
 0xabe   : > { %2551 = vmatpush3.bf16.msra.mxu1 %v2635_v61 }
 0xabf   : > { %v1681_v59 = vpack.c.bf16 %v1679_v58, %v1679_v58  ;;  %2564 = vmatprep.subr.bf16.mxu1 %v2742_v19  ;;  %v2644_v58 = vld [vmem:[%s2916_s30 + $0x8] sm:$0xff]  }
 0xac0   : > { %s3261_s21 = sadd.s32 4294967295, %s3260_s7  }
 0xac1   : > { %2545 = vmatmul.mubr.msk.bf16.vlgmr.msra.gmra.mxu0 %vm867_vm4, %v1681_v59  ;;  %v2645_v59 = vld [vmem:[%s2916_s30] sm:$0xff]   ;;  %p3191_p12 = scmp.eq.s32.totalorder %s3261_s21, 2 }
 0xac2   : > { %2560 = vmatprep.mubr.msk.bf16.mxu0 %vm2743_vm3, %v2742_v19  ;;  %2557 = vmatpush3.bf16.msra.mxu0 %v2636_v35 }
 0xac3   : > { %2558 = vmatprep.subr.bf16.mxu0 %v2742_v19  ;;  %p2692_p0 = pnand %p2691_p13, %p3191_p12 }
 0xac5   : > { %p2693_p1 = pneg %p2692_p0 }
 0xac6   : > { %2559 = vmatpush3.bf16.msra.mxu0 %v2637_v54 }
 0xac7   : > { %p2700_p5 = pnand %p2699_p4, %p2693_p1 }
 0xb79   : > { %v1724_v62 = vpop.f32.mrf.mxu1 }
 0xb7a   : > { %1780 = vrot.lane.b32.xlu0 %v1724_v62, %s2757_s23 }
 0xb7b   : > { %v2540_v63 = vpop.f32.mrf.mxu1 }
 0xb7d   : > { %v1727_v0 = vpop.f32.mrf.mxu1 }
 0xb7f   : > { %v2541_v1 = vpop.f32.mrf.mxu1 }
 0xb81   : > { %v1772_v2 = vpop.f32.mrf.mxu0 }
 0xb82   : > { %1782 = vrot.lane.b32.xlu1 %v1772_v2, %s2757_s23 }
 0xb83   : > { %v2546_v3 = vpop.f32.mrf.mxu0 }
 0xb85   : > { %v1775_v6 = vpop.f32.mrf.mxu0 }
 0xb87   : > { %v2547_v7 = vpop.f32.mrf.mxu0 }
 0xbec   : > { %v1781_v8 = vpop.permute.xlu0 %1780 }
 0xbed   : > { %1787 = vst.msk [vmem:[#allocation2] sm:$0xff] %vm1786_vm9, %v1781_v8 }
 0xbf4   : > { %v1783_v9 = vpop.permute.xlu1 %1782  ;;  %v1789_v10 = vld [vmem:[#allocation2] sm:$0xff] }
 0xbf5   : > { %1788 = vst.msk [vmem:[#allocation2 + $0x8] sm:$0xff] %vm1786_vm9, %v1783_v9 }
 0xbfc   : > { %v1790_v11 = vld [vmem:[#allocation2 + $0x8] sm:$0xff] }
 0xbfd   : > { %v1791_v12 = vpack.c.bf16 %v1790_v11, %v1789_v10 }
 0xbff   : > { %2553 = vmatmul.mubr.msk.bf16.vlgmr.msra.gmra.mxu1 %vm745_vm2, %v1791_v12 }
 0xc00   : > { %2580 = vmatprep.mubr.msk.bf16.mxu1 %vm2743_vm3, %v2742_v19  ;;  %2565 = vmatpush3.bf16.msra.mxu1 %v2638_v52 }
 0xc01   : > { %2566 = vmatprep.subr.bf16.mxu1 %v2742_v19 }
 0xc04   : > { %2567 = vmatpush3.bf16.msra.mxu1 %v2639_v53 }
 0xc05   : > { %2568 = vmatprep.subr.bf16.mxu1 %v2742_v19 }
 0xc08   : > { %2569 = vmatpush3.bf16.msra.mxu1 %v2640_v55 }
 0xc09   : > { %2570 = vmatprep.subr.bf16.mxu1 %v2742_v19 }
 0xc0c   : > { %2571 = vmatpush3.bf16.msra.mxu1 %v2641_v56 }
 0xc0d   : > { %2572 = vmatprep.subr.bf16.mxu1 %v2742_v19 }
 0xc10   : > { %2573 = vmatpush3.bf16.msra.mxu1 %v2642_v57 }
 0xc11   : > { %2574 = vmatprep.subr.bf16.mxu1 %v2742_v19 }
 0xc14   : > { %2575 = vmatpush3.bf16.msra.mxu1 %v2643_v42 }
 0xc15   : > { %2576 = vmatprep.subr.bf16.mxu1 %v2742_v19 }
 0xc18   : > { %2577 = vmatpush3.bf16.msra.mxu1 %v2644_v58 }
 0xc19   : > { %2578 = vmatprep.subr.bf16.mxu1 %v2742_v19 }
 0xc1c   : > { %2579 = vmatpush3.bf16.msra.mxu1 %v2645_v59 }
 0xcbf   : > { %v1852_v14 = vpop.f32.mrf.mxu1 }
 0xcc0   : > { %v1853_v15 = vadd.f32 %v2356_v13, %v1852_v14 }
 0xcc1   : > { %v2554_v16 = vpop.f32.mrf.mxu1 }
 0xcc2   : > { %v3135_v17 = vadd.f32 %v1853_v15, %v2924_v4 }
 0xcc3   : > { %v1855_v18 = vpop.f32.mrf.mxu1 }
 0xcc4   : > { %v1856_v20 = vadd.f32 %v2356_v13, %v1855_v18  ;;  %v1863_v21 = vsel %vm745_vm2, %v3135_v17, 0.0  ;;  %v2367_v18 = vld [vmem:[%s716_s16] ss:$0 sm:$0xff] }
 0xcc5   : > { %1864 = vadd.xlane.f32.xlu0 %v1863_v21  ;;  %v2555_v22 = vpop.f32.mrf.mxu1 }
 0xcc6   : > { %v3140_v23 = vadd.f32 %v1856_v20, %v2926_v5 }
 0xcc8   : > { %v1866_v25 = vsel %vm745_vm2, %v3140_v23, 0.0 }
 0xcc9   : > { %1867 = vadd.xlane.f32.xlu1 %v1866_v25 }
 0xd4e   : > { %v1865_v26 = vpop.xlane.xlu0 %1864 }
 0xd4f   : > { %v1869_v27 = vmul.f32 0.03125, %v1865_v26 }
 0xd51   : > { %v1871_v4 = vsub.f32 %v3135_v17, %v1869_v27 }
 0xd52   : > { %v1868_v29 = vpop.xlane.xlu1 %1867 }
 0xd53   : > { %v1870_v30 = vmul.f32 0.03125, %v1868_v29  ;;  %v1873_v31 = vmul.f32 %v1871_v4, %v1871_v4 }
 0xd55   : > { %v1872_v32 = vsub.f32 %v3140_v23, %v1870_v30  ;;  %v1875_v33 = vsel %vm745_vm2, %v1873_v31, 0.0 }
 0xd56   : > { %1876 = vadd.xlane.f32.xlu0 %v1875_v33 }
 0xd57   : > { %v1874_v34 = vmul.f32 %v1872_v32, %v1872_v32 }
 0xd59   : > { %v1878_v5 = vsel %vm745_vm2, %v1874_v34, 0.0 }
 0xd5a   : > { %1879 = vadd.xlane.f32.xlu0 %v1878_v5 }
 0xddf   : > { %v1877_v36 = vpop.xlane.xlu0 %1876 }
 0xde0   : > { %v1881_v37 = vmul.f32 0.03125, %v1877_v36 }
 0xde2   : > { %v1883_v38 = vadd.f32 1e-05, %v1881_v37 }
 0xde3   : > { %v1880_v39 = vpop.xlane.xlu0 %1879 }
 0xde4   : > { %2682 = vrsqrt.f32 %v1883_v38  ;;  %v1882_v40 = vmul.f32 0.03125, %v1880_v39 }
 0xde6   : > { %v1884_v41 = vadd.f32 1e-05, %v1882_v40 }
 0xde8   : > { %2684 = vrsqrt.f32 %v1884_v41 }
 0xdf1   : > { %v2683_v46 = vpop.eup %2682 }
 0xdf2   : > { %v1887_v24 = vmul.f32 %v2683_v46, %v1871_v4 }
 0xdf4   : > { %v1895_v45 = vmul.f32 %v2360_v28, %v1887_v24 }
 0xdf5   : > { %v2685_v43 = vpop.eup %2684 }
 0xdf6   : > { %v1888_v44 = vmul.f32 %v2685_v43, %v1872_v32  ;;  %v1903_v49 = vadd.f32 %v2361_v47, %v1895_v45 }
 0xdf8   : > { %v1896_v48 = vmul.f32 %v2360_v28, %v1888_v44 }
 0xdfa   : > { %v1904_v50 = vadd.f32 %v2361_v47, %v1896_v48 }
 0xdfc   : > { %v1905_v51 = vpack.c.bf16 %v1904_v50, %v1903_v49 }
 0xdfe   : > { %2561 = vmatmul.mubr.msk.bf16.vlgmr.msra.gmra.mxu0 %vm745_vm2, %v1905_v51 }
 0xebe   : > { %v1966_v61 = vpop.f32.mrf.mxu0 }
 0xebf   : > { %v1967_v63 = vadd.f32 %v2362_v60, %v1966_v61 }
 0xec0   : > { %v2562_v62 = vpop.f32.mrf.mxu0 }
 0xec1   : > { %v1973_v3 = vmul.f32 1.702, %v1967_v63 }
 0xec2   : > { %v1969_v0 = vpop.f32.mrf.mxu0 }
 0xec3   : > { %v1970_v1 = vadd.f32 %v2362_v60, %v1969_v0 }
 0xec4   : > { %v2563_v2 = vpop.f32.mrf.mxu0 }
 0xec5   : > { %v1974_v6 = vmul.f32 1.702, %v1970_v1 }
 0xec7   : > { %v1975_v7 = vpack.c.bf16 %v1974_v6, %v1973_v3 }
 0xec9   : > { %v2366_v8 = vmul.bf16 3216621497, %v1975_v7 }
 0xecb   : > { %2686 = vpow.bf16 %v2366_v8 }
 0xed9   : > { %v2687_v19 = vpop.eup %2686 }
 0xeda   : > { %v1980_v9 = vadd.bf16 1065369472, %v2687_v19 }
 0xedc   : > { %2688 = vrcp.bf16 %v1980_v9 }
 0xeea   : > { %v2689_v10 = vpop.eup %2688 }
 0xeeb   : > { %v1982_v11 = vmul.bf16 1065369472, %v2689_v10 }
 0xeed   : > { %v1983_v12 = vunpack.c.l.bf16 %v1982_v11  ;;  %v1984_v13 = vunpack.c.h.bf16 %v1982_v11 }
 0xeef   : > { %v1985_v14 = vmul.f32 %v1983_v12, %v1967_v63  ;;  %v1986_v15 = vmul.f32 %v1984_v13, %v1970_v1 }
 0xef1   : > { %v1987_v16 = vpack.c.bf16 %v1986_v15, %v1985_v14 }
 0xef3   : > { %2581 = vmatmul.mubr.bf16.vlgmr.msra.gmra.mxu1 %v1987_v16 }
 0xfb3   : > { %v2093_v20 = vpop.f32.mrf.mxu1 }
 0xfb4   : > { %v2094_v21 = vadd.f32 %v2367_v18, %v2093_v20 }
 0xfb5   : > { %v2582_v22 = vpop.f32.mrf.mxu1 }
 0xfb6   : > { %v2100_v25 = vadd.f32 %v2094_v21, %v3135_v17 }
 0xfb7   : > { %v2096_v26 = vpop.f32.mrf.mxu1 }
 0xfb8   : > { %2102 = vst.msk [vmem:[#allocation3] sm:$0xff] %vm745_vm2, %v2100_v25  ;;  %v2097_v27 = vadd.f32 %v2367_v18, %v2096_v26 }
 0xfb9   : > { %v2583_v4 = vpop.f32.mrf.mxu1 }
 0xfba   : > { %v2101_v29 = vadd.f32 %v2097_v27, %v3140_v23 }
 0xfbc   : > { %2103 = vst.msk [vmem:[#allocation3 + $0x8] sm:$0xff] %vm745_vm2, %v2101_v29 }
 0xfbd   : > { %2703 = shalt.err (!%p2700_p5)
}
 0xfbe   : > { %s2759_s16 = smov 128   ;;  %s3263_s3 = sld [smem:[#allocation14_spill]] }
 0xfc4   : > { %2585 = dma.vmem_to_hbm [thread:$0]  (%p3191_p12), %s2114_s27, 256, %s3263_s3, [#allocation4], %s2759_s16, %s2759_s16, %s2755_s17  }
 0xfc5   : > { %2727 = dma.done.wait (%p3191_p12), [#allocation4], 256  }
 0xfc6   : > { %2729 = vsyncadd (%p3191_p12), [#allocation4], 4294967040 }
 0xfc7 PF: > { %s3264_s15 = sld [smem:[#allocation7_spill]] }
 0xfc8   : > { %s3265_s29 = sld [smem:[#allocation6_spill]] }
 0xfc9   : > { %s3266_s30 = sld [smem:[#allocation8_spill]] }
 0xfcd   : > { %s25_s15 = sadd.s32 1, %s3264_s15  }
 0xfce   : > { %p22_p6 = scmp.ge.s32.totalorder %s25_s15, 5  }
 0xfd0   :  { %24 = sbr.rel (!%p22_p6) target bundleno = 9 (0x9), region = 151 }
 0xfd5   :  { %2129 = vsyncpa [#allocation4], 1 }
 0xfd6   :  { %2131 = vsyncpa [#allocation4 + $0x1], 1 }

</bundles_post_ra>
